<compile_context>
chip_gen: v5e
topology: v5e:2x2
jax: 0.10.0
libtpu: 0.0.40
codegen_flags: <defaults>
</compile_context>

<pallas_src>
import jax
import jax.numpy as jnp
from jax import lax
from jax.experimental import pallas as pl
from jax.experimental.pallas import tpu as pltpu


# ---------------------------------------------------------------------------
# One-time setup: dense ConvTranspose1d matrices + BN pooling matrices
# ---------------------------------------------------------------------------
def conv_transpose1d_matrix(w, l_in, stride, padding):
    """Dense matrix M with out[n, co*Lout+t] = sum_{ci,l} x[n, ci*Lin+l] * M[ci*Lin+l, co*Lout+t].

    w: ConvTranspose1d weight of shape (Cin, Cout, K)  (PyTorch convention).
    """
    cin, cout, k = w.shape
    l_out = (l_in - 1) * stride - 2 * padding + k
    l_idx = jnp.arange(l_in)[:, None]                      # (Lin, 1)
    t_idx = jnp.arange(l_out)[None, :]                     # (1, Lout)
    tap = t_idx - stride * l_idx + padding                 # (Lin, Lout)
    valid = (tap >= 0) & (tap < k)
    tap_c = jnp.clip(tap, 0, k - 1)
    wg = w[:, :, tap_c]                                    # (Cin, Cout, Lin, Lout)
    wg = wg * valid[None, None, :, :].astype(w.dtype)
    m = jnp.transpose(wg, (0, 2, 1, 3)).reshape(cin * l_in, cout * l_out)
    return m, l_out


def _vmem_limit(need_bytes):
    # 2x for double-buffering plus fixed headroom; clamp to a value that is
    # safe on every generation (v7x has only 64 MiB physical VMEM).
    return int(min(64 << 20, max(16 << 20, 2 * need_bytes + (16 << 20))))


def make_decoder(w1, gamma, beta, w2, l_in, *, eps=1e-5, col_tile=512):
    """Precompute all weight-derived constants once and return a jitted forward(x)."""
    assert col_tile % 128 == 0
    cin, c1, _ = w1.shape

    t1, l2 = conv_transpose1d_matrix(w1.astype(jnp.float32), l_in, 2, 1)  # (Cin*L, C1*L2) f32
    t2, l3 = conv_transpose1d_matrix(w2.astype(jnp.float32), l2, 2, 1)    # (C1*L2, L3)   f32

    # Effective output-column tile: a multiple of 128 lanes, no larger than the
    # (rounded-up) output, capped at `col_tile`.  Demo L3=35 -> 128 (one block);
    # large L3 -> 512-wide stores and fewer grid steps.
    col_tile = max(128, min(col_tile, 128 * int(pl.cdiv(l3, 128))))
    n_col_blk = int(pl.cdiv(l3, col_tile))
    l3_pad = n_col_blk * col_tile

    # Second conv runs with bf16 MXU operands (f32 accumulation); first conv and
    # all BatchNorm statistics stay f32.
    t2_bf = jnp.pad(t2, ((0, 0), (0, l3_pad - l3))).astype(jnp.bfloat16)

    # Per-channel pooling / broadcast matrices for BatchNorm over (N, L2) — f32.
    pool = jnp.kron(jnp.eye(c1, dtype=jnp.float32),
                    jnp.ones((l2, 1), dtype=jnp.float32))                 # (C1*L2, C1)
    pool_t = pool.T                                                       # (C1, C1*L2)
    gb = jnp.stack([gamma, beta]).astype(jnp.float32)                     # (2, C1)

    t1, t2_bf, pool, pool_t, gb = jax.device_put((t1, t2_bf, pool, pool_t, gb))

    def conv1_bn(xv, t1v, poolv, pool_tv, gbv, inv_count):
        """ConvTranspose#1 (f32 MXU) + training-mode BatchNorm, two-pass variance."""
        y1 = jnp.dot(xv, t1v, preferred_element_type=jnp.float32)          # (N, C1*L2)
        s1 = jnp.sum(y1, axis=0, keepdims=True)                            # (1, C1*L2)
        mean_c = jnp.dot(s1, poolv,
                         preferred_element_type=jnp.float32) * inv_count   # (1, C1)
        mean_f = jnp.dot(mean_c, pool_tv,
                         preferred_element_type=jnp.float32)               # (1, C1*L2)
        d = y1 - mean_f
        s2 = jnp.sum(d * d, axis=0, keepdims=True)                         # (1, C1*L2)
        var_c = jnp.dot(s2, poolv,
                        preferred_element_type=jnp.float32) * inv_count    # (1, C1)
        inv = lax.rsqrt(var_c + eps)
        scale = gbv[0:1, :] * inv                                          # gamma * inv
        shift = gbv[1:2, :] - mean_c * scale                               # beta - mean*scale
        ss = jnp.concatenate([scale, shift], axis=0)                       # (2, C1)
        ss_f = jnp.dot(ss, pool_tv, preferred_element_type=jnp.float32)    # (2, C1*L2)
        return y1 * ss_f[0:1, :] + ss_f[1:2, :]                            # (N, C1*L2) f32

    full2 = lambda j: (0, 0)

    @jax.jit
    def forward(x):
        n = x.shape[0]
        x_flat = x.reshape(n, cin * l_in).astype(jnp.float32)  # no batch padding
        inv_count = 1.0 / float(n * l2)

        if n_col_blk == 1:
            # ----- Single fused pallas_call (no recomputation possible) -----
            def kernel(x_ref, t1_ref, pool_ref, pool_t_ref, gb_ref, t2_ref, o_ref):
                y1n = conv1_bn(x_ref[...], t1_ref[...], pool_ref[...],
                               pool_t_ref[...], gb_ref[...], inv_count)
                y2 = jnp.dot(y1n.astype(jnp.bfloat16), t2_ref[...],
                             preferred_element_type=jnp.float32)
                o_ref[...] = jnp.tanh(y2).astype(o_ref.dtype)

            need = (x_flat.size * 4 + t1.size * 4 + pool.size * 4 + pool_t.size * 4
                    + gb.size * 4 + t2_bf.size * 2 + n * l3_pad * 2)
            out = pl.pallas_call(
                kernel,
                grid=(1,),
                in_specs=[
                    pl.BlockSpec((n, cin * l_in), full2),        # x (full batch dim)
                    pl.BlockSpec((cin * l_in, c1 * l2), full2),  # t1 (f32)
                    pl.BlockSpec((c1 * l2, c1), full2),          # pool
                    pl.BlockSpec((c1, c1 * l2), full2),          # pool^T
                    pl.BlockSpec((2, c1), full2),                # [gamma; beta]
                    pl.BlockSpec((c1 * l2, col_tile), full2),    # t2 (bf16)
                ],
                out_specs=pl.BlockSpec((n, col_tile), full2),
                out_shape=jax.ShapeDtypeStruct((n, l3_pad), jnp.bfloat16),
                compiler_params=pltpu.CompilerParams(
                    dimension_semantics=("arbitrary",),
                    vmem_limit_bytes=_vmem_limit(need)),
            )(x_flat, t1, pool, pool_t, gb, t2_bf)
        else:
            # ----- Stage 1: conv1 + BN computed exactly once -> y1n (bf16) -----
            def k1(x_ref, t1_ref, pool_ref, pool_t_ref, gb_ref, y_ref):
                y_ref[...] = conv1_bn(x_ref[...], t1_ref[...], pool_ref[...],
                                      pool_t_ref[...], gb_ref[...],
                                      inv_count).astype(y_ref.dtype)

            need1 = (x_flat.size * 4 + t1.size * 4 + pool.size * 4 + pool_t.size * 4
                     + gb.size * 4 + n * c1 * l2 * 2)
            y1n = pl.pallas_call(
                k1,
                grid=(1,),
                in_specs=[
                    pl.BlockSpec((n, cin * l_in), full2),
                    pl.BlockSpec((cin * l_in, c1 * l2), full2),
                    pl.BlockSpec((c1 * l2, c1), full2),
                    pl.BlockSpec((c1, c1 * l2), full2),
                    pl.BlockSpec((2, c1), full2),
                ],
                out_specs=pl.BlockSpec((n, c1 * l2), full2),
                out_shape=jax.ShapeDtypeStruct((n, c1 * l2), jnp.bfloat16),
                compiler_params=pltpu.CompilerParams(
                    dimension_semantics=("arbitrary",),
                    vmem_limit_bytes=_vmem_limit(need1)),
            )(x_flat, t1, pool, pool_t, gb)

            # ----- Stage 2: column-gridded conv2 + tanh ("parallel" -> megacore) -----
            def k2(y_ref, t2_ref, o_ref):
                y2 = jnp.dot(y_ref[...], t2_ref[...],
                             preferred_element_type=jnp.float32)
                o_ref[...] = jnp.tanh(y2).astype(o_ref.dtype)

            need2 = (n * c1 * l2 * 2 + 2 * (c1 * l2 * col_tile * 2)
                     + 2 * (n * col_tile * 2))
            out = pl.pallas_call(
                k2,
                grid=(n_col_blk,),
                in_specs=[
                    pl.BlockSpec((n, c1 * l2), lambda j: (0, 0)),         # y1n (resident)
                    pl.BlockSpec((c1 * l2, col_tile), lambda j: (0, j)),  # t2 column block
                ],
                out_specs=pl.BlockSpec((n, col_tile), lambda j: (0, j)),
                out_shape=jax.ShapeDtypeStruct((n, l3_pad), jnp.bfloat16),
                compiler_params=pltpu.CompilerParams(
                    dimension_semantics=("parallel",),
                    vmem_limit_bytes=_vmem_limit(need2)),
            )(y1n, t2_bf)

        return out[:, :l3].reshape(n, 1, l3)

    return forward


# ---------------------------------------------------------------------------
# Pure-JAX reference (f32) for a correctness smoke-check
# ---------------------------------------------------------------------------
def decoder_reference(x, w1, gamma, beta, w2, *, eps=1e-5):
    def conv_t(inp, w, stride, pad):
        _, _, k = w.shape
        wf = jnp.flip(w, axis=-1).transpose(1, 0, 2)                  # (Cout, Cin, K)
        return lax.conv_general_dilated(
            inp, wf, window_strides=(1,),
            padding=[(k - 1 - pad, k - 1 - pad)],
            lhs_dilation=(stride,),
            dimension_numbers=("NCH", "OIH", "NCH"))

    y = conv_t(x, w1, 2, 1)
    mean = jnp.mean(y, axis=(0, 2), keepdims=True)
    var = jnp.mean((y - mean) ** 2, axis=(0, 2), keepdims=True)
    y = (y - mean) * lax.rsqrt(var + eps)
    y = y * gamma.reshape(1, -1, 1) + beta.reshape(1, -1, 1)
    y = conv_t(y, w2, 2, 1)
    return jnp.tanh(y)


# ---------------------------------------------------------------------------
# Main
# ---------------------------------------------------------------------------
if __name__ == "__main__":
    key = jax.random.PRNGKey(0)
    k_x, k_w1, k_w2, k_g, k_b, k_x2 = jax.random.split(key, 6)

    CIN, C1, K1 = 64, 32, 4
    C2, K2 = 1, 7

    w1 = 0.1 * jax.random.normal(k_w1, (CIN, C1, K1), dtype=jnp.float32)
    w2 = 0.1 * jax.random.normal(k_w2, (C1, C2, K2), dtype=jnp.float32)
    gamma = 1.0 + 0.1 * jax.random.normal(k_g, (C1,), dtype=jnp.float32)
    beta = 0.1 * jax.random.normal(k_b, (C1,), dtype=jnp.float32)

    # --- Shape implied by the module: (N=2, 64, 8) -> fused single-call path ---
    N, L = 2, 8
    x = jax.random.normal(k_x, (N, CIN, L), dtype=jnp.float32)
    decoder = make_decoder(w1, gamma, beta, w2, L)          # one-time setup
    out = jax.block_until_ready(decoder(x))                 # per-step: one pallas_call
    ref = decoder_reference(x, w1, gamma, beta, w2)
    assert out.shape == (N, 1, 4 * L + 3), out.shape
    err = float(jnp.max(jnp.abs(out.astype(jnp.float32) - ref)))
    assert err < 3e-2, err

    # --- Longer input exercising the hoisted two-call path (n_col_blk > 1) ---
    L_BIG = 32
    x2 = jax.random.normal(k_x2, (N, CIN, L_BIG), dtype=jnp.float32)
    decoder_big = make_decoder(w1, gamma, beta, w2, L_BIG, col_tile=128)
    out2 = jax.block_until_ready(decoder_big(x2))
    ref2 = decoder_reference(x2, w1, gamma, beta, w2)
    assert out2.shape == (N, 1, 4 * L_BIG + 3), out2.shape
    err2 = float(jnp.max(jnp.abs(out2.astype(jnp.float32) - ref2)))
    assert err2 < 5e-2, err2

    print("KERNEL_OK")
</pallas_src>

<mosaic_0001>
module attributes {stable_mosaic.version = 11 : i64} {
  func.func @kernel(%arg0: i32, %arg1: memref<2x512xf32, #tpu.memory_space<vmem>>, %arg2: memref<512x512xf32, #tpu.memory_space<vmem>>, %arg3: memref<512x32xf32, #tpu.memory_space<vmem>>, %arg4: memref<32x512xf32, #tpu.memory_space<vmem>>, %arg5: memref<2x32xf32, #tpu.memory_space<vmem>>, %arg6: memref<512x128xbf16, #tpu.memory_space<vmem>>, %arg7: memref<2x128xbf16, #tpu.memory_space<vmem>>) attributes {dimension_semantics = [#tpu.dimension_semantics<arbitrary>], iteration_bounds = array<i64: 1>, scalar_prefetch = 0 : i64, scratch_operands = 0 : i64, tpu.core_type = #tpu.core_type<tc>, window_params = [{pipeline_mode = #tpu.pipeline_mode<synchronous>, transform_indices = @transform_0, window_bounds = array<i64: 2, 512>}, {pipeline_mode = #tpu.pipeline_mode<synchronous>, transform_indices = @transform_1, window_bounds = array<i64: 512, 512>}, {pipeline_mode = #tpu.pipeline_mode<synchronous>, transform_indices = @transform_2, window_bounds = array<i64: 512, 32>}, {pipeline_mode = #tpu.pipeline_mode<synchronous>, transform_indices = @transform_3, window_bounds = array<i64: 32, 512>}, {pipeline_mode = #tpu.pipeline_mode<synchronous>, transform_indices = @transform_4, window_bounds = array<i64: 2, 32>}, {pipeline_mode = #tpu.pipeline_mode<synchronous>, transform_indices = @transform_5, window_bounds = array<i64: 512, 128>}, {pipeline_mode = #tpu.pipeline_mode<synchronous>, transform_indices = @transform_6, window_bounds = array<i64: 2, 128>}]} {
    %c0 = arith.constant 0 : index
    %c0_0 = arith.constant 0 : index
    %0 = vector.load %arg1[%c0, %c0_0] : memref<2x512xf32, #tpu.memory_space<vmem>>, vector<2x512xf32>
    %c0_1 = arith.constant 0 : index
    %c0_2 = arith.constant 0 : index
    %1 = vector.load %arg2[%c0_1, %c0_2] : memref<512x512xf32, #tpu.memory_space<vmem>>, vector<512x512xf32>
    %c0_3 = arith.constant 0 : index
    %c0_4 = arith.constant 0 : index
    %2 = vector.load %arg3[%c0_3, %c0_4] : memref<512x32xf32, #tpu.memory_space<vmem>>, vector<512x32xf32>
    %c0_5 = arith.constant 0 : index
    %c0_6 = arith.constant 0 : index
    %3 = vector.load %arg4[%c0_5, %c0_6] : memref<32x512xf32, #tpu.memory_space<vmem>>, vector<32x512xf32>
    %c0_7 = arith.constant 0 : index
    %c0_8 = arith.constant 0 : index
    %4 = vector.load %arg5[%c0_7, %c0_8] : memref<2x32xf32, #tpu.memory_space<vmem>>, vector<2x32xf32>
    %cst = arith.constant dense<0.000000e+00> : vector<2x512xf32>
    %5 = tpu.matmul %0, %1, %cst {dimension_numbers = #tpu.dot_dimension_numbers<[1], [0], [0], [1], [0, 0, 1, 1], [], []>} : vector<2x512xf32>, vector<512x512xf32>, vector<2x512xf32> -> vector<2x512xf32>
    %cst_9 = arith.constant dense<0.000000e+00> : vector<512xf32>
    %6 = vector.multi_reduction <add>, %5, %cst_9 [0] : vector<2x512xf32> to vector<512xf32>
    %7 = vector.shape_cast %6 : vector<512xf32> to vector<1x512xf32>
    %cst_10 = arith.constant dense<0.000000e+00> : vector<1x32xf32>
    %8 = tpu.matmul %7, %2, %cst_10 {dimension_numbers = #tpu.dot_dimension_numbers<[1], [0], [0], [1], [0, 0, 1, 1], [], []>} : vector<1x512xf32>, vector<512x32xf32>, vector<1x32xf32> -> vector<1x32xf32>
    %cst_11 = arith.constant 3.125000e-02 : f32
    %9 = vector.broadcast %cst_11 : f32 to vector<1x32xf32>
    %10 = arith.mulf %8, %9 : vector<1x32xf32>
    %cst_12 = arith.constant dense<0.000000e+00> : vector<1x512xf32>
    %11 = tpu.matmul %10, %3, %cst_12 {dimension_numbers = #tpu.dot_dimension_numbers<[1], [0], [0], [1], [0, 0, 1, 1], [], []>} : vector<1x32xf32>, vector<32x512xf32>, vector<1x512xf32> -> vector<1x512xf32>
    %12 = vector.broadcast %11 : vector<1x512xf32> to vector<2x512xf32>
    %13 = arith.subf %5, %12 : vector<2x512xf32>
    %14 = arith.mulf %13, %13 : vector<2x512xf32>
    %cst_13 = arith.constant dense<0.000000e+00> : vector<512xf32>
    %15 = vector.multi_reduction <add>, %14, %cst_13 [0] : vector<2x512xf32> to vector<512xf32>
    %16 = vector.shape_cast %15 : vector<512xf32> to vector<1x512xf32>
    %cst_14 = arith.constant dense<0.000000e+00> : vector<1x32xf32>
    %17 = tpu.matmul %16, %2, %cst_14 {dimension_numbers = #tpu.dot_dimension_numbers<[1], [0], [0], [1], [0, 0, 1, 1], [], []>} : vector<1x512xf32>, vector<512x32xf32>, vector<1x32xf32> -> vector<1x32xf32>
    %cst_15 = arith.constant 3.125000e-02 : f32
    %18 = vector.broadcast %cst_15 : f32 to vector<1x32xf32>
    %19 = arith.mulf %17, %18 : vector<1x32xf32>
    %cst_16 = arith.constant 9.99999974E-6 : f32
    %20 = vector.broadcast %cst_16 : f32 to vector<1x32xf32>
    %21 = arith.addf %19, %20 : vector<1x32xf32>
    %22 = math.rsqrt %21 : vector<1x32xf32>
    %23 = vector.extract_strided_slice %4 {offsets = [0, 0], sizes = [1, 32], strides = [1, 1]} : vector<2x32xf32> to vector<1x32xf32>
    %24 = arith.mulf %23, %22 : vector<1x32xf32>
    %25 = vector.extract_strided_slice %4 {offsets = [1, 0], sizes = [1, 32], strides = [1, 1]} : vector<2x32xf32> to vector<1x32xf32>
    %26 = arith.mulf %10, %24 : vector<1x32xf32>
    %27 = arith.subf %25, %26 : vector<1x32xf32>
    %28 = tpu.concatenate %24, %27 in 0 : vector<1x32xf32>, vector<1x32xf32> -> vector<2x32xf32>
    %cst_17 = arith.constant dense<0.000000e+00> : vector<2x512xf32>
    %29 = tpu.matmul %28, %3, %cst_17 {dimension_numbers = #tpu.dot_dimension_numbers<[1], [0], [0], [1], [0, 0, 1, 1], [], []>} : vector<2x32xf32>, vector<32x512xf32>, vector<2x512xf32> -> vector<2x512xf32>
    %30 = vector.extract_strided_slice %29 {offsets = [0, 0], sizes = [1, 512], strides = [1, 1]} : vector<2x512xf32> to vector<1x512xf32>
    %31 = vector.broadcast %30 : vector<1x512xf32> to vector<2x512xf32>
    %32 = arith.mulf %5, %31 : vector<2x512xf32>
    %33 = vector.extract_strided_slice %29 {offsets = [1, 0], sizes = [1, 512], strides = [1, 1]} : vector<2x512xf32> to vector<1x512xf32>
    %34 = vector.broadcast %33 : vector<1x512xf32> to vector<2x512xf32>
    %35 = arith.addf %32, %34 : vector<2x512xf32>
    %36 = arith.truncf %35 : vector<2x512xf32> to vector<2x512xbf16>
    %c0_18 = arith.constant 0 : index
    %c0_19 = arith.constant 0 : index
    %37 = vector.load %arg6[%c0_18, %c0_19] : memref<512x128xbf16, #tpu.memory_space<vmem>>, vector<512x128xbf16>
    %cst_20 = arith.constant dense<0.000000e+00> : vector<2x128xf32>
    %38 = tpu.matmul %36, %37, %cst_20 {dimension_numbers = #tpu.dot_dimension_numbers<[1], [0], [0], [1], [0, 0, 1, 1], [], []>} : vector<2x512xbf16>, vector<512x128xbf16>, vector<2x128xf32> -> vector<2x128xf32>
    %39 = math.tanh %38 : vector<2x128xf32>
    %40 = arith.truncf %39 : vector<2x128xf32> to vector<2x128xbf16>
    %c0_21 = arith.constant 0 : index
    %c0_22 = arith.constant 0 : index
    %41 = vector.load %arg7[%c0_21, %c0_22] : memref<2x128xbf16, #tpu.memory_space<vmem>>, vector<2x128xbf16>
    tpu.vector_store %arg7[%c0_21, %c0_22], %40 {strides = array<i32>} : memref<2x128xbf16, #tpu.memory_space<vmem>>, vector<2x128xbf16>,
    return
  }
  func.func @transform_0(%arg0: i32) -> (i32, i32) {
    %c0_i32 = arith.constant 0 : i32
    %c0_i32_0 = arith.constant 0 : i32
    %c0_i32_1 = arith.constant 0 : i32
    return %c0_i32, %c0_i32_0 : i32, i32
  }
  func.func @transform_1(%arg0: i32) -> (i32, i32) {
    %c0_i32 = arith.constant 0 : i32
    %c0_i32_0 = arith.constant 0 : i32
    %c0_i32_1 = arith.constant 0 : i32
    return %c0_i32, %c0_i32_0 : i32, i32
  }
  func.func @transform_2(%arg0: i32) -> (i32, i32) {
    %c0_i32 = arith.constant 0 : i32
    %c0_i32_0 = arith.constant 0 : i32
    %c0_i32_1 = arith.constant 0 : i32
    return %c0_i32, %c0_i32_0 : i32, i32
  }
  func.func @transform_3(%arg0: i32) -> (i32, i32) {
    %c0_i32 = arith.constant 0 : i32
    %c0_i32_0 = arith.constant 0 : i32
    %c0_i32_1 = arith.constant 0 : i32
    return %c0_i32, %c0_i32_0 : i32, i32
  }
  func.func @transform_4(%arg0: i32) -> (i32, i32) {
    %c0_i32 = arith.constant 0 : i32
    %c0_i32_0 = arith.constant 0 : i32
    %c0_i32_1 = arith.constant 0 : i32
    return %c0_i32, %c0_i32_0 : i32, i32
  }
  func.func @transform_5(%arg0: i32) -> (i32, i32) {
    %c0_i32 = arith.constant 0 : i32
    %c0_i32_0 = arith.constant 0 : i32
    %c0_i32_1 = arith.constant 0 : i32
    return %c0_i32, %c0_i32_0 : i32, i32
  }
  func.func @transform_6(%arg0: i32) -> (i32, i32) {
    %c0_i32 = arith.constant 0 : i32
    %c0_i32_0 = arith.constant 0 : i32
    %c0_i32_1 = arith.constant 0 : i32
    return %c0_i32, %c0_i32_0 : i32, i32
  }
}

</mosaic_0001>

<bundles_post_ra>
// kernel: forward.1
= control target key start
LH: loop header
LB: loop body
LE: loop exit
PB: predicated region body
PF: predicated region fallthrough
CT: control target
= control target key end

     0   :  { %11 = vsyncpa [#allocation3], 0  ;;  %s2290_s0 = inlined_call_operand.vmem [shape: f32[2,512], index: 0, kind: input, shape index: {}]   ;;  %s2291_s1 = inlined_call_operand.hbm [shape: f32[512,512], index: 1, kind: input, shape index: {}]   ;;  %s2292_s2 = inlined_call_operand.hbm [shape: f32[512,32], index: 2, kind: input, shape index: {}]   ;;  %s2293_s3 = inlined_call_operand.hbm [shape: f32[32,512], index: 3, kind: input, shape index: {}]   ;;  %s2294_s4 = inlined_call_operand.vmem [shape: f32[2,32], index: 4, kind: input, shape index: {}]   ;;  %s2295_s5 = inlined_call_operand.vmem [shape: bf16[512,128], index: 5, kind: input, shape index: {}]   ;;  %s2296_s6 = inlined_call_operand.vmem [shape: bf16[2,128], index: 6, kind: output, shape index: {}]  }
   0x1   :  { %12 = vsyncpa [#allocation5], 0  ;;  %s32_s23 = sshll.u32 %s2292_s2, 4  ;;  %s1747_s24 = smov [#allocation4]   ;;  %s33_s23 = int_to_ptr.hbm [resolvable:$true] %s32_s23 }
   0x2   :  { %s34_s25 = sshll.u32 %s1747_s24, 4  ;;  %s19_s28 = sshll.u32 %s2291_s1, 4  ;;  %s35_s25 = int_to_ptr.vmem [resolvable:$true] %s34_s25  ;;  %s20_s28 = int_to_ptr.hbm [resolvable:$true] %s19_s28 }
   0x3   :  { %s1748_s29 = smov 128   ;;  %s1749_s30 = smov 8  }
   0x4   :  { %40 = dma.hbm_to_vmem [thread:$0]  %s33_s23, 8192, %s35_s25, [#allocation5], %s1748_s29, %s1748_s29, %s1749_s30  }
   0x5   :  { %s1750_s7 = smov [#allocation2]   ;;  %s1751_s9 = smov 512  }
   0x6   :  { %s21_s8 = sshll.u32 %s1750_s7, 4  ;;  %s1752_s10 = smov 32   ;;  %s22_s8 = int_to_ptr.vmem [resolvable:$true] %s21_s8 }
   0x7   :  { %27 = dma.hbm_to_vmem [thread:$0]  %s20_s28, 32768, %s22_s8, [#allocation3], %s1751_s9, %s1751_s9, %s1752_s10  }
   0x8   :  { %s45_s12 = sshll.u32 %s2293_s3, 4  ;;  %s1753_s13 = smov [#allocation6]   ;;  %s46_s12 = int_to_ptr.hbm [resolvable:$true] %s45_s12 }
   0x9   :  { %s47_s14 = sshll.u32 %s1753_s13, 4  ;;  %s48_s14 = int_to_ptr.vmem [resolvable:$true] %s47_s14 }
   0xa   :  { %53 = dma.hbm_to_vmem [thread:$0]  %s46_s12, 2048, %s48_s14, [#allocation5], %s1751_s9, %s1751_s9, %s1752_s10  }
   0xb   :  { %1743 = dma.done.wait [#allocation3], 32768  }
   0xc   :  { %1744 = vsyncadd [#allocation3], 4294934528 }
   0xd   :  { %1745 = dma.done.wait [#allocation5], 10240  }
   0xe   :  { %1746 = vsyncadd [#allocation5], 4294957056  ;;  %v259_v0 = vld [vmem:[#allocation2 + $0x5e0] sm:$0xff]  ;;  %v260_v62 = vld [vmem:[#allocation2 + $0x5e8] sm:$0xff]  ;;  %vm738_vm0 = vcmask 1041408   ;;  %vm848_vm1 = vcmask 261120  }
   0xf   :  { %v255_v1 = vld [vmem:[#allocation2 + $0x5c0] sm:$0xff]  ;;  %458 = vmatpush.msra.mxu2 %v259_v0  ;;  %v324_v63 = vld [vmem:[#allocation2 + $0x7e8] sm:$0xff]  ;;  %vm1070_vm5 = vcmask 1040384  }
  0x10   :  { %v323_v2 = vld [vmem:[#allocation2 + $0x7e0] sm:$0xff] }
  0x11   :  { %478 = vmatpush.msra.mxu3 %v323_v2  ;;  %v131_v3 = vld [vmem:[#allocation2 + $0x1e0] sm:$0xff]  ;;  %459 = vmatpush.msra.mxu2 %v255_v1  ;;  %v256_v2 = vld [vmem:[#allocation2 + $0x5c8] sm:$0xff] }
  0x12   :  { %v195_v4 = vld [vmem:[#allocation2 + $0x3e0] sm:$0xff]  ;;  %418 = vmatpush.msra.mxu0 %v131_v3  ;;  %v132_v3 = vld [vmem:[#allocation2 + $0x1e8] sm:$0xff] }
  0x13   :  { %v251_v5 = vld [vmem:[#allocation2 + $0x5a0] sm:$0xff]  ;;  %438 = vmatpush.msra.mxu1 %v195_v4  ;;  %v196_v4 = vld [vmem:[#allocation2 + $0x3e8] sm:$0xff] }
  0x14   :  { %v319_v6 = vld [vmem:[#allocation2 + $0x7c0] sm:$0xff]  ;;  %460 = vmatpush.msra.mxu2 %v251_v5  ;;  %v320_v5 = vld [vmem:[#allocation2 + $0x7c8] sm:$0xff] }
  0x15   :  { %v127_v7 = vld [vmem:[#allocation2 + $0x1c0] sm:$0xff]  ;;  %479 = vmatpush.msra.mxu3 %v319_v6  ;;  %v252_v6 = vld [vmem:[#allocation2 + $0x5a8] sm:$0xff] }
  0x16   :  { %v191_v8 = vld [vmem:[#allocation2 + $0x3c0] sm:$0xff]  ;;  %419 = vmatpush.msra.mxu0 %v127_v7  ;;  %v128_v7 = vld [vmem:[#allocation2 + $0x1c8] sm:$0xff] }
  0x17   :  { %v315_v9 = vld [vmem:[#allocation2 + $0x7a0] sm:$0xff]  ;;  %439 = vmatpush.msra.mxu1 %v191_v8  ;;  %v192_v8 = vld [vmem:[#allocation2 + $0x3c8] sm:$0xff] }
  0x18   :  { %v123_v10 = vld [vmem:[#allocation2 + $0x1a0] sm:$0xff]  ;;  %480 = vmatpush.msra.mxu3 %v315_v9  ;;  %v316_v9 = vld [vmem:[#allocation2 + $0x7a8] sm:$0xff] }
  0x19   :  { %v247_v11 = vld [vmem:[#allocation2 + $0x580] sm:$0xff]  ;;  %420 = vmatpush.msra.mxu0 %v123_v10  ;;  %v248_v10 = vld [vmem:[#allocation2 + $0x588] sm:$0xff] }
  0x1a   :  { %v187_v12 = vld [vmem:[#allocation2 + $0x3a0] sm:$0xff]  ;;  %461 = vmatpush.msra.mxu2 %v247_v11  ;;  %v124_v11 = vld [vmem:[#allocation2 + $0x1a8] sm:$0xff] }
  0x1b   :  { %v311_v13 = vld [vmem:[#allocation2 + $0x780] sm:$0xff]  ;;  %440 = vmatpush.msra.mxu1 %v187_v12  ;;  %v70_v12 = vld [vmem:[%s2290_s0] sm:$0xff] }
  0x1c   :  { %v119_v14 = vld [vmem:[#allocation2 + $0x180] sm:$0xff]  ;;  %481 = vmatpush.msra.mxu3 %v311_v13  ;;  %v188_v13 = vld [vmem:[#allocation2 + $0x3a8] sm:$0xff]  ;;  %409 = vst [vmem:[#allocation1] ss:$4 sm:$0xff] %v70_v12  ;;  %v129_v12 = vld [vmem:[#allocation2 + $0x1d0] sm:$0xff] }
  0x1d   :  { %v183_v15 = vld [vmem:[#allocation2 + $0x380] sm:$0xff]  ;;  %421 = vmatpush.msra.mxu0 %v119_v14  ;;  %v312_v14 = vld [vmem:[#allocation2 + $0x788] sm:$0xff] }
  0x1e   :  { %v243_v16 = vld [vmem:[#allocation2 + $0x560] sm:$0xff]  ;;  %441 = vmatpush.msra.mxu1 %v183_v15  ;;  %v244_v15 = vld [vmem:[#allocation2 + $0x568] sm:$0xff] }
  0x1f   :  { %v307_v17 = vld [vmem:[#allocation2 + $0x760] sm:$0xff]  ;;  %462 = vmatpush.msra.mxu2 %v243_v16  ;;  %v120_v16 = vld [vmem:[#allocation2 + $0x188] sm:$0xff] }
  0x20   :  { %v115_v18 = vld [vmem:[#allocation2 + $0x160] sm:$0xff]  ;;  %482 = vmatpush.msra.mxu3 %v307_v17  ;;  %v184_v17 = vld [vmem:[#allocation2 + $0x388] sm:$0xff] }
  0x21   :  { %v179_v19 = vld [vmem:[#allocation2 + $0x360] sm:$0xff]  ;;  %422 = vmatpush.msra.mxu0 %v115_v18  ;;  %v308_v18 = vld [vmem:[#allocation2 + $0x768] sm:$0xff] }
  0x22   :  { %v239_v20 = vld [vmem:[#allocation2 + $0x540] sm:$0xff]  ;;  %442 = vmatpush.msra.mxu1 %v179_v19  ;;  %v240_v19 = vld [vmem:[#allocation2 + $0x548] sm:$0xff] }
  0x23   :  { %v303_v21 = vld [vmem:[#allocation2 + $0x740] sm:$0xff]  ;;  %463 = vmatpush.msra.mxu2 %v239_v20  ;;  %v116_v20 = vld [vmem:[#allocation2 + $0x168] sm:$0xff] }
  0x24   :  { %v111_v22 = vld [vmem:[#allocation2 + $0x140] sm:$0xff]  ;;  %483 = vmatpush.msra.mxu3 %v303_v21  ;;  %v180_v21 = vld [vmem:[#allocation2 + $0x368] sm:$0xff] }
  0x25   :  { %v175_v23 = vld [vmem:[#allocation2 + $0x340] sm:$0xff]  ;;  %423 = vmatpush.msra.mxu0 %v111_v22  ;;  %v304_v22 = vld [vmem:[#allocation2 + $0x748] sm:$0xff] }
  0x26   :  { %v235_v24 = vld [vmem:[#allocation2 + $0x520] sm:$0xff]  ;;  %443 = vmatpush.msra.mxu1 %v175_v23  ;;  %v236_v23 = vld [vmem:[#allocation2 + $0x528] sm:$0xff] }
  0x27   :  { %v299_v25 = vld [vmem:[#allocation2 + $0x720] sm:$0xff]  ;;  %464 = vmatpush.msra.mxu2 %v235_v24  ;;  %v112_v24 = vld [vmem:[#allocation2 + $0x148] sm:$0xff] }
  0x28   :  { %v107_v26 = vld [vmem:[#allocation2 + $0x120] sm:$0xff]  ;;  %484 = vmatpush.msra.mxu3 %v299_v25  ;;  %v176_v25 = vld [vmem:[#allocation2 + $0x348] sm:$0xff] }
  0x29   :  { %v171_v27 = vld [vmem:[#allocation2 + $0x320] sm:$0xff]  ;;  %424 = vmatpush.msra.mxu0 %v107_v26  ;;  %v300_v26 = vld [vmem:[#allocation2 + $0x728] sm:$0xff] }
  0x2a   :  { %v231_v28 = vld [vmem:[#allocation2 + $0x500] sm:$0xff]  ;;  %444 = vmatpush.msra.mxu1 %v171_v27  ;;  %v232_v27 = vld [vmem:[#allocation2 + $0x508] sm:$0xff] }
  0x2b   :  { %v295_v29 = vld [vmem:[#allocation2 + $0x700] sm:$0xff]  ;;  %465 = vmatpush.msra.mxu2 %v231_v28  ;;  %v108_v28 = vld [vmem:[#allocation2 + $0x128] sm:$0xff] }
  0x2c   :  { %v103_v30 = vld [vmem:[#allocation2 + $0x100] sm:$0xff]  ;;  %485 = vmatpush.msra.mxu3 %v295_v29  ;;  %v172_v29 = vld [vmem:[#allocation2 + $0x328] sm:$0xff] }
  0x2d   :  { %v167_v31 = vld [vmem:[#allocation2 + $0x300] sm:$0xff]  ;;  %425 = vmatpush.msra.mxu0 %v103_v30  ;;  %v296_v30 = vld [vmem:[#allocation2 + $0x708] sm:$0xff] }
  0x2e   :  { %v227_v32 = vld [vmem:[#allocation2 + $0x4e0] sm:$0xff]  ;;  %445 = vmatpush.msra.mxu1 %v167_v31  ;;  %v228_v31 = vld [vmem:[#allocation2 + $0x4e8] sm:$0xff] }
  0x2f   :  { %v291_v33 = vld [vmem:[#allocation2 + $0x6e0] sm:$0xff]  ;;  %466 = vmatpush.msra.mxu2 %v227_v32  ;;  %v104_v32 = vld [vmem:[#allocation2 + $0x108] sm:$0xff] }
  0x30   :  { %v99_v34 = vld [vmem:[#allocation2 + $0xe0] sm:$0xff]  ;;  %486 = vmatpush.msra.mxu3 %v291_v33  ;;  %v168_v33 = vld [vmem:[#allocation2 + $0x308] sm:$0xff] }
  0x31   :  { %v163_v35 = vld [vmem:[#allocation2 + $0x2e0] sm:$0xff]  ;;  %426 = vmatpush.msra.mxu0 %v99_v34  ;;  %v292_v34 = vld [vmem:[#allocation2 + $0x6e8] sm:$0xff] }
  0x32   :  { %v223_v36 = vld [vmem:[#allocation2 + $0x4c0] sm:$0xff]  ;;  %446 = vmatpush.msra.mxu1 %v163_v35  ;;  %v224_v35 = vld [vmem:[#allocation2 + $0x4c8] sm:$0xff] }
  0x33   :  { %v287_v37 = vld [vmem:[#allocation2 + $0x6c0] sm:$0xff]  ;;  %467 = vmatpush.msra.mxu2 %v223_v36  ;;  %v100_v36 = vld [vmem:[#allocation2 + $0xe8] sm:$0xff] }
  0x34   :  { %v95_v38 = vld [vmem:[#allocation2 + $0xc0] sm:$0xff]  ;;  %487 = vmatpush.msra.mxu3 %v287_v37  ;;  %v164_v37 = vld [vmem:[#allocation2 + $0x2e8] sm:$0xff] }
  0x35   :  { %v159_v39 = vld [vmem:[#allocation2 + $0x2c0] sm:$0xff]  ;;  %427 = vmatpush.msra.mxu0 %v95_v38  ;;  %v288_v38 = vld [vmem:[#allocation2 + $0x6c8] sm:$0xff] }
  0x36   :  { %v219_v40 = vld [vmem:[#allocation2 + $0x4a0] sm:$0xff]  ;;  %447 = vmatpush.msra.mxu1 %v159_v39  ;;  %v220_v39 = vld [vmem:[#allocation2 + $0x4a8] sm:$0xff] }
  0x37   :  { %v283_v41 = vld [vmem:[#allocation2 + $0x6a0] sm:$0xff]  ;;  %468 = vmatpush.msra.mxu2 %v219_v40  ;;  %v96_v40 = vld [vmem:[#allocation2 + $0xc8] sm:$0xff] }
  0x38   :  { %v91_v42 = vld [vmem:[#allocation2 + $0xa0] sm:$0xff]  ;;  %488 = vmatpush.msra.mxu3 %v283_v41  ;;  %v160_v41 = vld [vmem:[#allocation2 + $0x2c8] sm:$0xff] }
  0x39   :  { %v155_v43 = vld [vmem:[#allocation2 + $0x2a0] sm:$0xff]  ;;  %428 = vmatpush.msra.mxu0 %v91_v42  ;;  %v284_v42 = vld [vmem:[#allocation2 + $0x6a8] sm:$0xff] }
  0x3a   :  { %v215_v44 = vld [vmem:[#allocation2 + $0x480] sm:$0xff]  ;;  %448 = vmatpush.msra.mxu1 %v155_v43  ;;  %v216_v43 = vld [vmem:[#allocation2 + $0x488] sm:$0xff] }
  0x3b   :  { %v279_v45 = vld [vmem:[#allocation2 + $0x680] sm:$0xff]  ;;  %469 = vmatpush.msra.mxu2 %v215_v44  ;;  %v92_v44 = vld [vmem:[#allocation2 + $0xa8] sm:$0xff] }
  0x3c   :  { %v87_v46 = vld [vmem:[#allocation2 + $0x80] sm:$0xff]  ;;  %489 = vmatpush.msra.mxu3 %v279_v45  ;;  %v1801_v45 = vld.sshfl [vmem:[#allocation1 + $0x10] sm:$0xff pattern:$0x73625140] }
  0x3d   :  { %v151_v47 = vld [vmem:[#allocation2 + $0x280] sm:$0xff]  ;;  %429 = vmatpush.msra.mxu0 %v87_v46  ;;  %v156_v46 = vld [vmem:[#allocation2 + $0x2a8] sm:$0xff] }
  0x3e   :  { %v211_v48 = vld [vmem:[#allocation2 + $0x460] sm:$0xff]  ;;  %449 = vmatpush.msra.mxu1 %v151_v47  ;;  %v212_v47 = vld [vmem:[#allocation2 + $0x468] sm:$0xff] }
  0x3f   :  { %v275_v49 = vld [vmem:[#allocation2 + $0x660] sm:$0xff]  ;;  %470 = vmatpush.msra.mxu2 %v211_v48  ;;  %v280_v48 = vld [vmem:[#allocation2 + $0x688] sm:$0xff] }
  0x40   :  { %v83_v50 = vld [vmem:[#allocation2 + $0x60] sm:$0xff]  ;;  %490 = vmatpush.msra.mxu3 %v275_v49  ;;  %v1803_v49 = vld.sshfl [vmem:[#allocation1 + $0x18] sm:$0xff pattern:$0x73625140] }
  0x41   :  { %v147_v51 = vld [vmem:[#allocation2 + $0x260] sm:$0xff]  ;;  %430 = vmatpush.msra.mxu0 %v83_v50  ;;  %v88_v50 = vld [vmem:[#allocation2 + $0x88] sm:$0xff] }
  0x42   :  { %v207_v52 = vld [vmem:[#allocation2 + $0x440] sm:$0xff]  ;;  %450 = vmatpush.msra.mxu1 %v147_v51  ;;  %v152_v51 = vld [vmem:[#allocation2 + $0x288] sm:$0xff] }
  0x43   :  { %v271_v53 = vld [vmem:[#allocation2 + $0x640] sm:$0xff]  ;;  %471 = vmatpush.msra.mxu2 %v207_v52  ;;  %v208_v52 = vld [vmem:[#allocation2 + $0x448] sm:$0xff] }
  0x44   :  { %v79_v54 = vld [vmem:[#allocation2 + $0x40] sm:$0xff]  ;;  %491 = vmatpush.msra.mxu3 %v271_v53  ;;  %v276_v53 = vld [vmem:[#allocation2 + $0x668] sm:$0xff] }
  0x45   :  { %v143_v55 = vld [vmem:[#allocation2 + $0x240] sm:$0xff]  ;;  %431 = vmatpush.msra.mxu0 %v79_v54  ;;  %v1806_v54 = vld.sshfl [vmem:[#allocation1] sm:$0xff pattern:$0x73625140] }
  0x46   :  { %v203_v56 = vld [vmem:[#allocation2 + $0x420] sm:$0xff]  ;;  %451 = vmatpush.msra.mxu1 %v143_v55 }
  0x47   :  { %v267_v57 = vld [vmem:[#allocation2 + $0x620] sm:$0xff]  ;;  %472 = vmatpush.msra.mxu2 %v203_v56  ;;  %v84_v56 = vld [vmem:[#allocation2 + $0x68] sm:$0xff] }
  0x48   :  { %v75_v58 = vld [vmem:[#allocation2 + $0x20] sm:$0xff]  ;;  %492 = vmatpush.msra.mxu3 %v267_v57  ;;  %v148_v57 = vld [vmem:[#allocation2 + $0x268] sm:$0xff] }
  0x49   :  { %v139_v59 = vld [vmem:[#allocation2 + $0x220] sm:$0xff]  ;;  %432 = vmatpush.msra.mxu0 %v75_v58  ;;  %v204_v58 = vld [vmem:[#allocation2 + $0x428] sm:$0xff] }
  0x4a   :  { %v199_v60 = vld [vmem:[#allocation2 + $0x400] sm:$0xff]  ;;  %452 = vmatpush.msra.mxu1 %v139_v59  ;;  %v272_v59 = vld [vmem:[#allocation2 + $0x648] sm:$0xff] }
  0x4b   :  { %v263_v61 = vld [vmem:[#allocation2 + $0x600] sm:$0xff]  ;;  %473 = vmatpush.msra.mxu2 %v199_v60  ;;  %v80_v60 = vld [vmem:[#allocation2 + $0x48] sm:$0xff] }
  0x4c   :  { %v71_v0 = vld [vmem:[#allocation2] sm:$0xff]  ;;  %493 = vmatpush.msra.mxu3 %v263_v61  ;;  %474 = vmatmul.f32.vlgmr.msra.gmra.mxu2 %v1801_v45  ;;  %v144_v61 = vld [vmem:[#allocation2 + $0x248] sm:$0xff] }
  0x4d   :  { %v135_v1 = vld [vmem:[#allocation2 + $0x200] sm:$0xff]  ;;  %538 = vmatpush.msrb.mxu2 %v260_v62  ;;  %433 = vmatpush.msra.mxu0 %v71_v0  ;;  %v200_v62 = vld [vmem:[#allocation2 + $0x408] sm:$0xff]  ;;  %v261_v0 = vld [vmem:[#allocation2 + $0x5f0] sm:$0xff] }
  0x4e   :  { %558 = vmatpush.msrb.mxu3 %v324_v63  ;;  %453 = vmatpush.msra.mxu1 %v135_v1  ;;  %v1809_v55 = vld.sshfl [vmem:[#allocation1 + $0x8] sm:$0xff pattern:$0x73625140]  ;;  %v268_v63 = vld [vmem:[#allocation2 + $0x628] sm:$0xff] }
  0x4f   :  { %539 = vmatpush.msrb.mxu2 %v256_v2  ;;  %498 = vmatpush.msrb.mxu0 %v132_v3  ;;  %v76_v1 = vld [vmem:[#allocation2 + $0x28] sm:$0xff] }
  0x50   :  { %518 = vmatpush.msrb.mxu1 %v196_v4  ;;  %559 = vmatpush.msrb.mxu3 %v320_v5  ;;  %v140_v2 = vld [vmem:[#allocation2 + $0x228] sm:$0xff]  ;;  %v257_v4 = vld [vmem:[#allocation2 + $0x5d0] sm:$0xff] }
  0x51   :  { %540 = vmatpush.msrb.mxu2 %v252_v6  ;;  %499 = vmatpush.msrb.mxu0 %v128_v7  ;;  %v264_v3 = vld [vmem:[#allocation2 + $0x608] sm:$0xff]  ;;  %v325_v5 = vld [vmem:[#allocation2 + $0x7f0] sm:$0xff] }
  0x52   :  { %519 = vmatpush.msrb.mxu1 %v192_v8  ;;  %560 = vmatpush.msrb.mxu3 %v316_v9  ;;  %v72_v6 = vld [vmem:[#allocation2 + $0x8] sm:$0xff]  ;;  %v133_v8 = vld [vmem:[#allocation2 + $0x1f0] sm:$0xff] }
  0x53   :  { %541 = vmatpush.msrb.mxu2 %v248_v10  ;;  %500 = vmatpush.msrb.mxu0 %v124_v11  ;;  %v136_v7 = vld [vmem:[#allocation2 + $0x208] sm:$0xff]  ;;  %v197_v9 = vld [vmem:[#allocation2 + $0x3f0] sm:$0xff] }
  0x54   :  { %520 = vmatpush.msrb.mxu1 %v188_v13  ;;  %561 = vmatpush.msrb.mxu3 %v312_v14  ;;  %v253_v10 = vld [vmem:[#allocation2 + $0x5b0] sm:$0xff] }
  0x55   :  { %542 = vmatpush.msrb.mxu2 %v244_v15  ;;  %501 = vmatpush.msrb.mxu0 %v120_v16  ;;  %v321_v11 = vld [vmem:[#allocation2 + $0x7d0] sm:$0xff] }
  0x56   :  { %521 = vmatpush.msrb.mxu1 %v184_v17  ;;  %562 = vmatpush.msrb.mxu3 %v308_v18  ;;  %v193_v13 = vld [vmem:[#allocation2 + $0x3d0] sm:$0xff] }
  0x57   :  { %543 = vmatpush.msrb.mxu2 %v240_v19  ;;  %502 = vmatpush.msrb.mxu0 %v116_v20  ;;  %v249_v14 = vld [vmem:[#allocation2 + $0x590] sm:$0xff] }
  0x58   :  { %522 = vmatpush.msrb.mxu1 %v180_v21  ;;  %563 = vmatpush.msrb.mxu3 %v304_v22  ;;  %v317_v15 = vld [vmem:[#allocation2 + $0x7b0] sm:$0xff] }
  0x59   :  { %544 = vmatpush.msrb.mxu2 %v236_v23  ;;  %503 = vmatpush.msrb.mxu0 %v112_v24  ;;  %v125_v16 = vld [vmem:[#allocation2 + $0x1b0] sm:$0xff] }
  0x5a   :  { %523 = vmatpush.msrb.mxu1 %v176_v25  ;;  %564 = vmatpush.msrb.mxu3 %v300_v26  ;;  %v189_v17 = vld [vmem:[#allocation2 + $0x3b0] sm:$0xff] }
  0x5b   :  { %545 = vmatpush.msrb.mxu2 %v232_v27  ;;  %504 = vmatpush.msrb.mxu0 %v108_v28  ;;  %v245_v18 = vld [vmem:[#allocation2 + $0x570] sm:$0xff] }
  0x5c   :  { %524 = vmatpush.msrb.mxu1 %v172_v29  ;;  %565 = vmatpush.msrb.mxu3 %v296_v30  ;;  %v313_v19 = vld [vmem:[#allocation2 + $0x790] sm:$0xff] }
  0x5d   :  { %546 = vmatpush.msrb.mxu2 %v228_v31  ;;  %505 = vmatpush.msrb.mxu0 %v104_v32  ;;  %v121_v20 = vld [vmem:[#allocation2 + $0x190] sm:$0xff] }
  0x5e   :  { %525 = vmatpush.msrb.mxu1 %v168_v33  ;;  %566 = vmatpush.msrb.mxu3 %v292_v34  ;;  %v185_v21 = vld [vmem:[#allocation2 + $0x390] sm:$0xff] }
  0x5f   :  { %547 = vmatpush.msrb.mxu2 %v224_v35  ;;  %506 = vmatpush.msrb.mxu0 %v100_v36  ;;  %v241_v22 = vld [vmem:[#allocation2 + $0x550] sm:$0xff] }
  0x60   :  { %526 = vmatpush.msrb.mxu1 %v164_v37  ;;  %567 = vmatpush.msrb.mxu3 %v288_v38  ;;  %v309_v23 = vld [vmem:[#allocation2 + $0x770] sm:$0xff] }
  0x61   :  { %548 = vmatpush.msrb.mxu2 %v220_v39  ;;  %507 = vmatpush.msrb.mxu0 %v96_v40  ;;  %v117_v24 = vld [vmem:[#allocation2 + $0x170] sm:$0xff] }
  0x62   :  { %527 = vmatpush.msrb.mxu1 %v160_v41  ;;  %568 = vmatpush.msrb.mxu3 %v284_v42  ;;  %v181_v25 = vld [vmem:[#allocation2 + $0x370] sm:$0xff] }
  0x63   :  { %549 = vmatpush.msrb.mxu2 %v216_v43  ;;  %508 = vmatpush.msrb.mxu0 %v92_v44  ;;  %v237_v26 = vld [vmem:[#allocation2 + $0x530] sm:$0xff] }
  0x64   :  { %528 = vmatpush.msrb.mxu1 %v156_v46  ;;  %569 = vmatpush.msrb.mxu3 %v280_v48  ;;  %v305_v27 = vld [vmem:[#allocation2 + $0x750] sm:$0xff] }
  0x65   :  { %550 = vmatpush.msrb.mxu2 %v212_v47  ;;  %494 = vmatmul.f32.vlgmr.msra.gmra.mxu3 %v1803_v49  ;;  %v113_v28 = vld [vmem:[#allocation2 + $0x150] sm:$0xff] }
  0x66   :  { %509 = vmatpush.msrb.mxu0 %v88_v50  ;;  %529 = vmatpush.msrb.mxu1 %v152_v51  ;;  %v177_v29 = vld [vmem:[#allocation2 + $0x350] sm:$0xff] }
  0x67   :  { %551 = vmatpush.msrb.mxu2 %v208_v52  ;;  %570 = vmatpush.msrb.mxu3 %v276_v53  ;;  %v233_v30 = vld [vmem:[#allocation2 + $0x510] sm:$0xff] }
  0x68   :  { %434 = vmatmul.f32.vlgmr.msra.gmra.mxu0 %v1806_v54  ;;  %454 = vmatmul.f32.vlgmr.msra.gmra.mxu1 %v1809_v55  ;;  %v301_v31 = vld [vmem:[#allocation2 + $0x730] sm:$0xff] }
  0x69   :  { %510 = vmatpush.msrb.mxu0 %v84_v56  ;;  %530 = vmatpush.msrb.mxu1 %v148_v57  ;;  %v109_v32 = vld [vmem:[#allocation2 + $0x130] sm:$0xff] }
  0x6a   :  { %552 = vmatpush.msrb.mxu2 %v204_v58  ;;  %571 = vmatpush.msrb.mxu3 %v272_v59  ;;  %v173_v33 = vld [vmem:[#allocation2 + $0x330] sm:$0xff] }
  0x6b   :  { %511 = vmatpush.msrb.mxu0 %v80_v60  ;;  %531 = vmatpush.msrb.mxu1 %v144_v61  ;;  %v229_v34 = vld [vmem:[#allocation2 + $0x4f0] sm:$0xff] }
  0x6c   :  { %553 = vmatpush.msrb.mxu2 %v200_v62  ;;  %572 = vmatpush.msrb.mxu3 %v268_v63  ;;  %v297_v35 = vld [vmem:[#allocation2 + $0x710] sm:$0xff] }
  0x6d   :  { %554 = vmatmul.f32.vlgmr.msrb.gmra.mxu2 %v1801_v45  ;;  %512 = vmatpush.msrb.mxu0 %v76_v1  ;;  %v105_v36 = vld [vmem:[#allocation2 + $0x110] sm:$0xff] }
  0x6e   :  { %618 = vmatpush.msra.mxu2 %v261_v0  ;;  %532 = vmatpush.msrb.mxu1 %v140_v2  ;;  %v169_v37 = vld [vmem:[#allocation2 + $0x310] sm:$0xff] }
  0x6f   :  { %573 = vmatpush.msrb.mxu3 %v264_v3  ;;  %513 = vmatpush.msrb.mxu0 %v72_v6  ;;  %v225_v38 = vld [vmem:[#allocation2 + $0x4d0] sm:$0xff] }
  0x70   :  { %574 = vmatmul.f32.vlgmr.msrb.gmra.mxu3 %v1803_v49  ;;  %619 = vmatpush.msra.mxu2 %v257_v4  ;;  %v293_v39 = vld [vmem:[#allocation2 + $0x6f0] sm:$0xff]  ;;  %v262_v4 = vld [vmem:[#allocation2 + $0x5f8] sm:$0xff] }
  0x71   :  { %638 = vmatpush.msra.mxu3 %v325_v5  ;;  %533 = vmatpush.msrb.mxu1 %v136_v7  ;;  %v101_v40 = vld [vmem:[#allocation2 + $0xf0] sm:$0xff] }
  0x72   :  { %514 = vmatmul.f32.vlgmr.msrb.gmra.mxu0 %v1806_v54  ;;  %534 = vmatmul.f32.vlgmr.msrb.gmra.mxu1 %v1809_v55  ;;  %v165_v41 = vld [vmem:[#allocation2 + $0x2f0] sm:$0xff] }
  0x73   :  { %578 = vmatpush.msra.mxu0 %v133_v8  ;;  %598 = vmatpush.msra.mxu1 %v197_v9  ;;  %v221_v42 = vld [vmem:[#allocation2 + $0x4b0] sm:$0xff]  ;;  %v258_v8 = vld [vmem:[#allocation2 + $0x5d8] sm:$0xff] }
  0x74   :  { %620 = vmatpush.msra.mxu2 %v253_v10  ;;  %639 = vmatpush.msra.mxu3 %v321_v11  ;;  %v289_v43 = vld [vmem:[#allocation2 + $0x6d0] sm:$0xff]  ;;  %v326_v9 = vld [vmem:[#allocation2 + $0x7f8] sm:$0xff] }
  0x75   :  { %579 = vmatpush.msra.mxu0 %v129_v12  ;;  %599 = vmatpush.msra.mxu1 %v193_v13  ;;  %v97_v44 = vld [vmem:[#allocation2 + $0xd0] sm:$0xff]  ;;  %v134_v12 = vld [vmem:[#allocation2 + $0x1f8] sm:$0xff] }
  0x76   :  { %621 = vmatpush.msra.mxu2 %v249_v14  ;;  %640 = vmatpush.msra.mxu3 %v317_v15  ;;  %v161_v46 = vld [vmem:[#allocation2 + $0x2d0] sm:$0xff]  ;;  %v198_v13 = vld [vmem:[#allocation2 + $0x3f8] sm:$0xff] }
  0x77   :  { %580 = vmatpush.msra.mxu0 %v125_v16  ;;  %600 = vmatpush.msra.mxu1 %v189_v17  ;;  %v217_v47 = vld [vmem:[#allocation2 + $0x490] sm:$0xff]  ;;  %v254_v14 = vld [vmem:[#allocation2 + $0x5b8] sm:$0xff] }
  0x78   :  { %622 = vmatpush.msra.mxu2 %v245_v18  ;;  %641 = vmatpush.msra.mxu3 %v313_v19  ;;  %v285_v48 = vld [vmem:[#allocation2 + $0x6b0] sm:$0xff]  ;;  %v322_v15 = vld [vmem:[#allocation2 + $0x7d8] sm:$0xff] }
  0x79   :  { %581 = vmatpush.msra.mxu0 %v121_v20  ;;  %601 = vmatpush.msra.mxu1 %v185_v21  ;;  %v93_v50 = vld [vmem:[#allocation2 + $0xb0] sm:$0xff]  ;;  %v130_v16 = vld [vmem:[#allocation2 + $0x1d8] sm:$0xff] }
  0x7a   :  { %623 = vmatpush.msra.mxu2 %v241_v22  ;;  %642 = vmatpush.msra.mxu3 %v309_v23  ;;  %v157_v51 = vld [vmem:[#allocation2 + $0x2b0] sm:$0xff]  ;;  %v194_v17 = vld [vmem:[#allocation2 + $0x3d8] sm:$0xff] }
  0x7b   :  { %582 = vmatpush.msra.mxu0 %v117_v24  ;;  %602 = vmatpush.msra.mxu1 %v181_v25  ;;  %v213_v52 = vld [vmem:[#allocation2 + $0x470] sm:$0xff]  ;;  %v250_v18 = vld [vmem:[#allocation2 + $0x598] sm:$0xff] }
  0x7c   :  { %624 = vmatpush.msra.mxu2 %v237_v26  ;;  %643 = vmatpush.msra.mxu3 %v305_v27  ;;  %v281_v53 = vld [vmem:[#allocation2 + $0x690] sm:$0xff]  ;;  %v318_v19 = vld [vmem:[#allocation2 + $0x7b8] sm:$0xff] }
  0x7d   :  { %583 = vmatpush.msra.mxu0 %v113_v28  ;;  %603 = vmatpush.msra.mxu1 %v177_v29  ;;  %v89_v56 = vld [vmem:[#allocation2 + $0x90] sm:$0xff]  ;;  %v126_v20 = vld [vmem:[#allocation2 + $0x1b8] sm:$0xff] }
  0x7e   :  { %625 = vmatpush.msra.mxu2 %v233_v30  ;;  %644 = vmatpush.msra.mxu3 %v301_v31  ;;  %v153_v57 = vld [vmem:[#allocation2 + $0x290] sm:$0xff]  ;;  %v190_v21 = vld [vmem:[#allocation2 + $0x3b8] sm:$0xff] }
  0x7f   :  { %584 = vmatpush.msra.mxu0 %v109_v32  ;;  %604 = vmatpush.msra.mxu1 %v173_v33  ;;  %v209_v58 = vld [vmem:[#allocation2 + $0x450] sm:$0xff]  ;;  %v246_v22 = vld [vmem:[#allocation2 + $0x578] sm:$0xff] }
  0x80   :  { %626 = vmatpush.msra.mxu2 %v229_v34  ;;  %645 = vmatpush.msra.mxu3 %v297_v35  ;;  %v277_v59 = vld [vmem:[#allocation2 + $0x670] sm:$0xff]  ;;  %v314_v23 = vld [vmem:[#allocation2 + $0x798] sm:$0xff] }
  0x81   :  { %585 = vmatpush.msra.mxu0 %v105_v36  ;;  %605 = vmatpush.msra.mxu1 %v169_v37  ;;  %v85_v60 = vld [vmem:[#allocation2 + $0x70] sm:$0xff]  ;;  %v122_v24 = vld [vmem:[#allocation2 + $0x198] sm:$0xff] }
  0x82   :  { %627 = vmatpush.msra.mxu2 %v225_v38  ;;  %646 = vmatpush.msra.mxu3 %v293_v39  ;;  %v149_v61 = vld [vmem:[#allocation2 + $0x270] sm:$0xff]  ;;  %v186_v25 = vld [vmem:[#allocation2 + $0x398] sm:$0xff] }
  0x83   :  { %586 = vmatpush.msra.mxu0 %v101_v40  ;;  %606 = vmatpush.msra.mxu1 %v165_v41  ;;  %v205_v62 = vld [vmem:[#allocation2 + $0x430] sm:$0xff]  ;;  %v242_v26 = vld [vmem:[#allocation2 + $0x558] sm:$0xff] }
  0x84   :  { %628 = vmatpush.msra.mxu2 %v221_v42  ;;  %647 = vmatpush.msra.mxu3 %v289_v43  ;;  %v273_v63 = vld [vmem:[#allocation2 + $0x650] sm:$0xff]  ;;  %v310_v27 = vld [vmem:[#allocation2 + $0x778] sm:$0xff] }
  0x85   :  { %587 = vmatpush.msra.mxu0 %v97_v44  ;;  %607 = vmatpush.msra.mxu1 %v161_v46  ;;  %v81_v0 = vld [vmem:[#allocation2 + $0x50] sm:$0xff]  ;;  %v118_v28 = vld [vmem:[#allocation2 + $0x178] sm:$0xff] }
  0x86   :  { %629 = vmatpush.msra.mxu2 %v217_v47  ;;  %648 = vmatpush.msra.mxu3 %v285_v48  ;;  %v145_v1 = vld [vmem:[#allocation2 + $0x250] sm:$0xff]  ;;  %v182_v29 = vld [vmem:[#allocation2 + $0x378] sm:$0xff] }
  0x87   :  { %588 = vmatpush.msra.mxu0 %v93_v50  ;;  %608 = vmatpush.msra.mxu1 %v157_v51  ;;  %v201_v2 = vld [vmem:[#allocation2 + $0x410] sm:$0xff]  ;;  %v238_v30 = vld [vmem:[#allocation2 + $0x538] sm:$0xff] }
  0x88   :  { %630 = vmatpush.msra.mxu2 %v213_v52  ;;  %649 = vmatpush.msra.mxu3 %v281_v53  ;;  %v269_v3 = vld [vmem:[#allocation2 + $0x630] sm:$0xff]  ;;  %v306_v31 = vld [vmem:[#allocation2 + $0x758] sm:$0xff] }
  0x89   :  { %589 = vmatpush.msra.mxu0 %v89_v56  ;;  %609 = vmatpush.msra.mxu1 %v153_v57  ;;  %v77_v5 = vld [vmem:[#allocation2 + $0x30] sm:$0xff]  ;;  %v114_v32 = vld [vmem:[#allocation2 + $0x158] sm:$0xff] }
  0x8a   :  { %631 = vmatpush.msra.mxu2 %v209_v58  ;;  %650 = vmatpush.msra.mxu3 %v277_v59  ;;  %v141_v6 = vld [vmem:[#allocation2 + $0x230] sm:$0xff]  ;;  %v178_v33 = vld [vmem:[#allocation2 + $0x358] sm:$0xff] }
  0x8b   :  { %590 = vmatpush.msra.mxu0 %v85_v60  ;;  %610 = vmatpush.msra.mxu1 %v149_v61  ;;  %v265_v7 = vld [vmem:[#allocation2 + $0x610] sm:$0xff]  ;;  %v234_v34 = vld [vmem:[#allocation2 + $0x518] sm:$0xff] }
  0x8c   :  { %632 = vmatpush.msra.mxu2 %v205_v62  ;;  %651 = vmatpush.msra.mxu3 %v273_v63  ;;  %v73_v10 = vld [vmem:[#allocation2 + $0x10] sm:$0xff]  ;;  %v302_v35 = vld [vmem:[#allocation2 + $0x738] sm:$0xff] }
  0x8d   :  { %591 = vmatpush.msra.mxu0 %v81_v0  ;;  %611 = vmatpush.msra.mxu1 %v145_v1  ;;  %v137_v11 = vld [vmem:[#allocation2 + $0x210] sm:$0xff]  ;;  %v110_v36 = vld [vmem:[#allocation2 + $0x138] sm:$0xff] }
  0x8e   :  { %633 = vmatpush.msra.mxu2 %v201_v2  ;;  %652 = vmatpush.msra.mxu3 %v269_v3  ;;  %v174_v37 = vld [vmem:[#allocation2 + $0x338] sm:$0xff] }
  0x8f   :  { %634 = vmatmul.f32.vlgmr.msra.gmra.mxu2 %v1801_v45  ;;  %592 = vmatpush.msra.mxu0 %v77_v5  ;;  %v230_v38 = vld [vmem:[#allocation2 + $0x4f8] sm:$0xff] }
  0x90   :  { %698 = vmatpush.msrb.mxu2 %v262_v4  ;;  %612 = vmatpush.msra.mxu1 %v141_v6  ;;  %v298_v39 = vld [vmem:[#allocation2 + $0x718] sm:$0xff] }
  0x91   :  { %653 = vmatpush.msra.mxu3 %v265_v7  ;;  %593 = vmatpush.msra.mxu0 %v73_v10  ;;  %v106_v40 = vld [vmem:[#allocation2 + $0x118] sm:$0xff] }
  0x92   :  { %654 = vmatmul.f32.vlgmr.msra.gmra.mxu3 %v1803_v49  ;;  %699 = vmatpush.msrb.mxu2 %v258_v8  ;;  %v170_v41 = vld [vmem:[#allocation2 + $0x318] sm:$0xff] }
  0x93   :  { %718 = vmatpush.msrb.mxu3 %v326_v9  ;;  %613 = vmatpush.msra.mxu1 %v137_v11  ;;  %v226_v42 = vld [vmem:[#allocation2 + $0x4d8] sm:$0xff] }
  0x94   :  { %594 = vmatmul.f32.vlgmr.msra.gmra.mxu0 %v1806_v54  ;;  %614 = vmatmul.f32.vlgmr.msra.gmra.mxu1 %v1809_v55  ;;  %v294_v43 = vld [vmem:[#allocation2 + $0x6f8] sm:$0xff] }
  0x95   :  { %658 = vmatpush.msrb.mxu0 %v134_v12  ;;  %678 = vmatpush.msrb.mxu1 %v198_v13  ;;  %v102_v44 = vld [vmem:[#allocation2 + $0xf8] sm:$0xff] }
  0x96   :  { %700 = vmatpush.msrb.mxu2 %v254_v14  ;;  %719 = vmatpush.msrb.mxu3 %v322_v15  ;;  %v166_v46 = vld [vmem:[#allocation2 + $0x2f8] sm:$0xff]  ;;  %v1828_v15 = vld [vmem:[#allocation4 + $0x70] sm:$0xff] }
  0x97   :  { %659 = vmatpush.msrb.mxu0 %v130_v16  ;;  %679 = vmatpush.msrb.mxu1 %v194_v17  ;;  %v222_v47 = vld [vmem:[#allocation2 + $0x4b8] sm:$0xff]  ;;  %v1834_v16 = vld [vmem:[#allocation4 + $0x68] sm:$0xff] }
  0x98   :  { %701 = vmatpush.msrb.mxu2 %v250_v18  ;;  %720 = vmatpush.msrb.mxu3 %v318_v19  ;;  %v290_v48 = vld [vmem:[#allocation2 + $0x6d8] sm:$0xff]  ;;  %v1848_v17 = vld [vmem:[#allocation4 + $0xe8] sm:$0xff]  ;;  %v1854_v19 = vld [vmem:[#allocation4 + $0xe0] sm:$0xff] }
  0x99   :  { %660 = vmatpush.msrb.mxu0 %v126_v20  ;;  %680 = vmatpush.msrb.mxu1 %v190_v21  ;;  %v98_v50 = vld [vmem:[#allocation2 + $0xd8] sm:$0xff]  ;;  %v1852_v18 = vld [vmem:[#allocation4 + $0x48] sm:$0xff]  ;;  %v1858_v20 = vld [vmem:[#allocation4 + $0x40] sm:$0xff] }
  0x9a   :  { %702 = vmatpush.msrb.mxu2 %v246_v22  ;;  %721 = vmatpush.msrb.mxu3 %v314_v23  ;;  %v162_v51 = vld [vmem:[#allocation2 + $0x2d8] sm:$0xff]  ;;  %v1866_v23 = vld [vmem:[#allocation4 + $0xd0] sm:$0xff] }
  0x9b   :  { %661 = vmatpush.msrb.mxu0 %v122_v24  ;;  %681 = vmatpush.msrb.mxu1 %v186_v25  ;;  %v218_v52 = vld [vmem:[#allocation2 + $0x498] sm:$0xff]  ;;  %v1870_v24 = vld [vmem:[#allocation4 + $0x30] sm:$0xff]  ;;  %v1872_v25 = vld [vmem:[#allocation4 + $0xc8] sm:$0xff] }
  0x9c   :  { %703 = vmatpush.msrb.mxu2 %v242_v26  ;;  %722 = vmatpush.msrb.mxu3 %v310_v27  ;;  %v286_v53 = vld [vmem:[#allocation2 + $0x6b8] sm:$0xff]  ;;  %v1874_v26 = vld [vmem:[#allocation4 + $0x28] sm:$0xff]  ;;  %v1876_v27 = vld [vmem:[#allocation4 + $0xc0] sm:$0xff] }
  0x9d   :  { %662 = vmatpush.msrb.mxu0 %v118_v28  ;;  %682 = vmatpush.msrb.mxu1 %v182_v29  ;;  %v94_v56 = vld [vmem:[#allocation2 + $0xb8] sm:$0xff]  ;;  %v1882_v28 = vld [vmem:[#allocation4 + $0x20] sm:$0xff] }
  0x9e   :  { %704 = vmatpush.msrb.mxu2 %v238_v30  ;;  %723 = vmatpush.msrb.mxu3 %v306_v31  ;;  %v158_v57 = vld [vmem:[#allocation2 + $0x2b8] sm:$0xff]  ;;  %v1890_v31 = vld [vmem:[#allocation4 + $0xb0] sm:$0xff] }
  0x9f   :  { %663 = vmatpush.msrb.mxu0 %v114_v32  ;;  %683 = vmatpush.msrb.mxu1 %v178_v33  ;;  %v214_v58 = vld [vmem:[#allocation2 + $0x478] sm:$0xff]  ;;  %v1894_v32 = vld [vmem:[#allocation4 + $0x10] sm:$0xff]  ;;  %v1896_v33 = vld [vmem:[#allocation4 + $0xa8] sm:$0xff] }
  0xa0   :  { %705 = vmatpush.msrb.mxu2 %v234_v34  ;;  %724 = vmatpush.msrb.mxu3 %v302_v35  ;;  %v282_v59 = vld [vmem:[#allocation2 + $0x698] sm:$0xff]  ;;  %2322 = vst [vmem:[#allocation10_spill] sm:$0xff] %v1894_v32  ;;  %v1900_v34 = vld [vmem:[#allocation4 + $0x8] sm:$0xff]  ;;  %v1902_v35 = vld [vmem:[#allocation4 + $0xa0] sm:$0xff] }
  0xa1   :  { %664 = vmatpush.msrb.mxu0 %v110_v36  ;;  %684 = vmatpush.msrb.mxu1 %v174_v37  ;;  %v90_v60 = vld [vmem:[#allocation2 + $0x98] sm:$0xff]  ;;  %2323 = vst [vmem:[#allocation11_spill] sm:$0xff] %v1900_v34  ;;  %v1904_v36 = vld [vmem:[#allocation4] sm:$0xff] }
  0xa2   :  { %706 = vmatpush.msrb.mxu2 %v230_v38  ;;  %725 = vmatpush.msrb.mxu3 %v298_v39  ;;  %v154_v61 = vld [vmem:[#allocation2 + $0x298] sm:$0xff]  ;;  %2324 = vst [vmem:[#allocation12_spill] sm:$0xff] %v1904_v36  ;;  %v1910_v38 = vld [vmem:[#allocation4 + $0x90] sm:$0xff]  ;;  %v1914_v39 = vld [vmem:[#allocation4 + $0x88] sm:$0xff] }
  0xa3   :  { %665 = vmatpush.msrb.mxu0 %v106_v40  ;;  %685 = vmatpush.msrb.mxu1 %v170_v41  ;;  %v210_v62 = vld [vmem:[#allocation2 + $0x458] sm:$0xff]  ;;  %2326 = vst [vmem:[#allocation14_spill] sm:$0xff] %v1910_v38  ;;  %v1919_v41 = vld [vmem:[#allocation4 + $0x170] sm:$0xff] }
  0xa4   :  { %707 = vmatpush.msrb.mxu2 %v226_v42  ;;  %726 = vmatpush.msrb.mxu3 %v294_v43  ;;  %v278_v63 = vld [vmem:[#allocation2 + $0x678] sm:$0xff]  ;;  %2327 = vst [vmem:[#allocation15_spill] sm:$0xff] %v1914_v39  ;;  %v1921_v43 = vld [vmem:[#allocation4 + $0x80] sm:$0xff] }
  0xa5   :  { %666 = vmatpush.msrb.mxu0 %v102_v44  ;;  %686 = vmatpush.msrb.mxu1 %v166_v46  ;;  %v86_v0 = vld [vmem:[#allocation2 + $0x78] sm:$0xff]  ;;  %2328 = vst [vmem:[#allocation16_spill] sm:$0xff] %v1921_v43  ;;  %v1925_v46 = vld [vmem:[#allocation4 + $0x168] sm:$0xff] }
  0xa6   :  { %708 = vmatpush.msrb.mxu2 %v222_v47  ;;  %727 = vmatpush.msrb.mxu3 %v290_v48  ;;  %v150_v1 = vld [vmem:[#allocation2 + $0x278] sm:$0xff] }
  0xa7   :  { %667 = vmatpush.msrb.mxu0 %v98_v50  ;;  %687 = vmatpush.msrb.mxu1 %v162_v51  ;;  %v206_v2 = vld [vmem:[#allocation2 + $0x438] sm:$0xff]  ;;  %v1929_v50 = vld [vmem:[#allocation4 + $0x160] sm:$0xff] }
  0xa8   :  { %709 = vmatpush.msrb.mxu2 %v218_v52  ;;  %728 = vmatpush.msrb.mxu3 %v286_v53  ;;  %v274_v3 = vld [vmem:[#allocation2 + $0x658] sm:$0xff] }
  0xa9   :  { %668 = vmatpush.msrb.mxu0 %v94_v56  ;;  %688 = vmatpush.msrb.mxu1 %v158_v57  ;;  %v82_v4 = vld [vmem:[#allocation2 + $0x58] sm:$0xff]  ;;  %v1937_v57 = vld [vmem:[#allocation4 + $0x150] sm:$0xff] }
  0xaa   :  { %710 = vmatpush.msrb.mxu2 %v214_v58  ;;  %729 = vmatpush.msrb.mxu3 %v282_v59  ;;  %v146_v5 = vld [vmem:[#allocation2 + $0x258] sm:$0xff] }
  0xab   :  { %669 = vmatpush.msrb.mxu0 %v90_v60  ;;  %689 = vmatpush.msrb.mxu1 %v154_v61  ;;  %v202_v6 = vld [vmem:[#allocation2 + $0x418] sm:$0xff] }
  0xac   :  { %711 = vmatpush.msrb.mxu2 %v210_v62  ;;  %730 = vmatpush.msrb.mxu3 %v278_v63  ;;  %v270_v7 = vld [vmem:[#allocation2 + $0x638] sm:$0xff] }
  0xad   :  { %670 = vmatpush.msrb.mxu0 %v86_v0  ;;  %690 = vmatpush.msrb.mxu1 %v150_v1  ;;  %v78_v8 = vld [vmem:[#allocation2 + $0x38] sm:$0xff] }
  0xae   :  { %712 = vmatpush.msrb.mxu2 %v206_v2  ;;  %731 = vmatpush.msrb.mxu3 %v274_v3  ;;  %v142_v9 = vld [vmem:[#allocation2 + $0x238] sm:$0xff] }
  0xaf   :  { %671 = vmatpush.msrb.mxu0 %v82_v4  ;;  %691 = vmatpush.msrb.mxu1 %v146_v5  ;;  %v266_v10 = vld [vmem:[#allocation2 + $0x618] sm:$0xff]  ;;  %v1943_v4 = vld [vmem:[#allocation4 + $0x148] sm:$0xff] }
  0xb0   :  { %713 = vmatpush.msrb.mxu2 %v202_v6  ;;  %732 = vmatpush.msrb.mxu3 %v270_v7  ;;  %v74_v11 = vld [vmem:[#allocation2 + $0x18] sm:$0xff]  ;;  %v1948_v7 = vld [vmem:[#allocation4 + $0x140] sm:$0xff] }
  0xb1   :  { %714 = vmatmul.f32.vlgmr.msrb.gmra.mxu2 %v1801_v45  ;;  %672 = vmatpush.msrb.mxu0 %v78_v8  ;;  %v138_v12 = vld [vmem:[#allocation2 + $0x218] sm:$0xff]  ;;  %v1832_v45 = vld [vmem:[#allocation4 + $0xf0] sm:$0xff] }
  0xb2   :  { %692 = vmatpush.msrb.mxu1 %v142_v9  ;;  %733 = vmatpush.msrb.mxu3 %v266_v10  ;;  %v1822_v13 = vld [vmem:[#allocation4 + $0x78] sm:$0xff] }
  0xb3   :  { %734 = vmatmul.f32.vlgmr.msrb.gmra.mxu3 %v1803_v49  ;;  %673 = vmatpush.msrb.mxu0 %v74_v11  ;;  %v1825_v14 = vld [vmem:[#allocation4 + $0xf8] sm:$0xff]  ;;  %v1838_v49 = vld [vmem:[#allocation4 + $0x60] sm:$0xff] }
  0xb4   :  { %693 = vmatpush.msrb.mxu1 %v138_v12  ;;  %674 = vmatmul.f32.vlgmr.msrb.gmra.mxu0 %v1806_v54  ;;  %v1842_v54 = vld [vmem:[#allocation4 + $0x58] sm:$0xff] }
  0xb5   :  { %694 = vmatmul.f32.vlgmr.msrb.gmra.mxu1 %v1809_v55  ;;  %767 = vmatpush.msra.mxu0 %v1822_v13  ;;  %v1846_v55 = vld [vmem:[#allocation4 + $0x50] sm:$0xff]  ;;  %v1860_v21 = vld [vmem:[#allocation4 + $0xd8] sm:$0xff] }
  0xb6   :  { %787 = vmatpush.msra.mxu1 %v1825_v14  ;;  %v1864_v22 = vld [vmem:[#allocation4 + $0x38] sm:$0xff] }
  0xb7   :  { %768 = vmatpush.msra.mxu0 %v1828_v15  ;;  %v1884_v29 = vld [vmem:[#allocation4 + $0xb8] sm:$0xff] }
  0xb8   :  { %788 = vmatpush.msra.mxu1 %v1832_v45  ;;  %v1888_v30 = vld [vmem:[#allocation4 + $0x18] sm:$0xff] }
  0xb9   :  { %769 = vmatpush.msra.mxu0 %v1834_v16  ;;  %2321 = vst [vmem:[#allocation9_spill] sm:$0xff] %v1888_v30  ;;  %v1906_v37 = vld [vmem:[#allocation4 + $0x98] sm:$0xff] }
  0xba   :  { %789 = vmatpush.msra.mxu1 %v1848_v17  ;;  %2325 = vst [vmem:[#allocation13_spill] sm:$0xff] %v1906_v37  ;;  %v1917_v40 = vld [vmem:[#allocation4 + $0x178] sm:$0xff] }
  0xbb   :  { %770 = vmatpush.msra.mxu0 %v1838_v49  ;;  %807 = vmatpush.msra.mxu2 %v1917_v40  ;;  %v1932_v53 = vld [vmem:[#allocation4 + $0x158] sm:$0xff] }
  0xbc   :  { %790 = vmatpush.msra.mxu1 %v1854_v19  ;;  %v1953_v12 = vld [vmem:[#allocation4 + $0x138] sm:$0xff] }
  0xbd   :  { %771 = vmatpush.msra.mxu0 %v1842_v54  ;;  %808 = vmatpush.msra.mxu2 %v1919_v41 }
  0xbe   :  { %791 = vmatpush.msra.mxu1 %v1860_v21 }
  0xbf   :  { %772 = vmatpush.msra.mxu0 %v1846_v55  ;;  %809 = vmatpush.msra.mxu2 %v1925_v46 }
  0xc0   :  { %792 = vmatpush.msra.mxu1 %v1866_v23 }
  0xc1   :  { %773 = vmatpush.msra.mxu0 %v1852_v18  ;;  %810 = vmatpush.msra.mxu2 %v1929_v50 }
  0xc2   :  { %793 = vmatpush.msra.mxu1 %v1872_v25 }
  0xc3   :  { %774 = vmatpush.msra.mxu0 %v1858_v20  ;;  %811 = vmatpush.msra.mxu2 %v1932_v53 }
  0xc4   :  { %794 = vmatpush.msra.mxu1 %v1876_v27 }
  0xc5   :  { %775 = vmatpush.msra.mxu0 %v1864_v22  ;;  %812 = vmatpush.msra.mxu2 %v1937_v57 }
  0xc6   :  { %795 = vmatpush.msra.mxu1 %v1884_v29 }
  0xc7   :  { %776 = vmatpush.msra.mxu0 %v1870_v24  ;;  %813 = vmatpush.msra.mxu2 %v1943_v4 }
  0xc8   :  { %796 = vmatpush.msra.mxu1 %v1890_v31 }
  0xc9   :  { %777 = vmatpush.msra.mxu0 %v1874_v26  ;;  %814 = vmatpush.msra.mxu2 %v1948_v7 }
  0xca   :  { %797 = vmatpush.msra.mxu1 %v1896_v33 }
  0xcb   :  { %778 = vmatpush.msra.mxu0 %v1882_v28  ;;  %815 = vmatpush.msra.mxu2 %v1953_v12 }
  0xcc   :  { %798 = vmatpush.msra.mxu1 %v1902_v35 }
  0xcd   :  { %779 = vmatpush.msra.mxu0 %v1888_v30 }
  0xce   :  { %799 = vmatpush.msra.mxu1 %v1906_v37 }
  0xcf   :  { %780 = vmatpush.msra.mxu0 %v1894_v32  ;;  %v475_v48 = vpop.f32.mrf.mxu2 }
  0xd0   :  { %800 = vmatpush.msra.mxu1 %v1910_v38 }
  0xd1   :  { %781 = vmatpush.msra.mxu0 %v1900_v34 }
  0xd2   :  { %801 = vmatpush.msra.mxu1 %v1914_v39 }
  0xd3   :  { %782 = vmatpush.msra.mxu0 %v1904_v36 }
  0xd4   :  { %802 = vmatpush.msra.mxu1 %v1921_v43  ;;  %v2014_v43 = vld [vmem:[#allocation4 + $0x1a0] sm:$0xff] }
  0xe5   :  { %v435_v42 = vpop.f32.mrf.mxu0  ;;  %v455_v44 = vpop.f32.mrf.mxu1 }
  0xe6   :  { %v456_v47 = vadd.f32 %v455_v44, %v435_v42  ;;  %v1956_v44 = vld [vmem:[#allocation4 + $0x130] sm:$0xff] }
  0xe7   :  { %816 = vmatpush.msra.mxu2 %v1956_v44 }
  0xe8   :  { %v476_v51 = vadd.f32 %v475_v48, %v456_v47  ;;  %v495_v52 = vpop.f32.mrf.mxu3  ;;  %v1959_v48 = vld [vmem:[#allocation4 + $0x128] sm:$0xff] }
  0xe9   :  { %817 = vmatpush.msra.mxu2 %v1959_v48 }
  0xea   :  { %v1934_v56 = vadd.f32 %v495_v52, %v476_v51  ;;  %v1962_v52 = vld [vmem:[#allocation4 + $0x120] sm:$0xff] }
  0xeb   :  { %818 = vmatpush.msra.mxu2 %v1962_v52 }
  0xec   :  { %2329 = vst [vmem:[#allocation17_spill] sm:$0xff] %v1934_v56  ;;  %v739_v58 = vsel %vm738_vm0, %v1934_v56, 0.0  ;;  %v2003_v56 = vld [vmem:[#allocation4 + $0x1b8] sm:$0xff] }
  0xed   :  { %v740_v59 = vrot.slane %v739_v58, 4 }
  0xef   :  { %v515_v60 = vpop.f32.mrf.mxu0  ;;  %v741_v61 = vadd.f32 %v740_v59, %v739_v58  ;;  %v535_v62 = vpop.f32.mrf.mxu1  ;;  %v1965_v59 = vld [vmem:[#allocation4 + $0x118] sm:$0xff] }
  0xf0   :  { %v555_v63 = vpop.f32.mrf.mxu2  ;;  %v536_v0 = vadd.f32 %v535_v62, %v515_v60  ;;  %2331 = vst [vmem:[#allocation19_spill] sm:$0xff] %v1965_v59  ;;  %v1967_v60 = vld [vmem:[#allocation4 + $0x110] sm:$0xff]  ;;  %819 = vmatpush.msra.mxu2 %v1965_v59  ;;  %v1970_v62 = vld [vmem:[#allocation4 + $0x108] sm:$0xff] }
  0xf1   :  { %v742_v1 = vrot.slane %v741_v61, 2  ;;  %2332 = vst [vmem:[#allocation20_spill] sm:$0xff] %v1967_v60 }
  0xf2   :  { %v556_v2 = vadd.f32 %v555_v63, %v536_v0  ;;  %2333 = vst [vmem:[#allocation21_spill] sm:$0xff] %v1970_v62  ;;  %820 = vmatpush.msra.mxu2 %v1967_v60  ;;  %v1973_v63 = vld [vmem:[#allocation4 + $0x100] sm:$0xff]  ;;  %v1976_v0 = vld [vmem:[#allocation4 + $0x1f8] sm:$0xff] }
  0xf3   :  { %v575_v3 = vpop.f32.mrf.mxu3  ;;  %v743_v5 = vadd.f32 %v742_v1, %v741_v61  ;;  %2334 = vst [vmem:[#allocation22_spill] sm:$0xff] %v1973_v63  ;;  %v1978_v1 = vld [vmem:[#allocation4 + $0x1f0] sm:$0xff]  ;;  %827 = vmatpush.msra.mxu3 %v1976_v0 }
  0xf4   :  { %v1946_v6 = vadd.f32 %v575_v3, %v556_v2  ;;  %821 = vmatpush.msra.mxu2 %v1970_v62  ;;  %v1982_v2 = vld [vmem:[#allocation4 + $0x1e8] sm:$0xff]  ;;  %v1985_v3 = vld [vmem:[#allocation4 + $0x1e0] sm:$0xff] }
  0xf5   :  { %v744_v8 = vrot.slane %v743_v5, 1  ;;  %828 = vmatpush.msra.mxu3 %v1978_v1  ;;  %v2022_v62 = vld [vmem:[#allocation4 + $0x188] sm:$0xff] }
  0xf6   :  { %2330 = vst [vmem:[#allocation18_spill] sm:$0xff] %v1946_v6  ;;  %v746_v9 = vsel %vm738_vm0, %v1946_v6, 0.0  ;;  %822 = vmatpush.msra.mxu2 %v1973_v63 }
  0xf7   :  { %v747_v10 = vrot.slane %v746_v9, 4  ;;  %v745_v11 = vadd.f32 %v744_v8, %v743_v5  ;;  %829 = vmatpush.msra.mxu3 %v1982_v2  ;;  %v1988_v5 = vld [vmem:[#allocation4 + $0x1d8] sm:$0xff]  ;;  %v1991_v8 = vld [vmem:[#allocation4 + $0x1d0] sm:$0xff]  ;;  %2338 = vst [vmem:[#allocation26_spill] sm:$0xff] %v2022_v62 }
  0xf9   :  { %v748_v42 = vadd.f32 %v747_v10, %v746_v9  ;;  %783 = vmatmul.f32.vlgmr.msra.gmra.mxu0 %v745_v11  ;;  %830 = vmatpush.msra.mxu3 %v1985_v3 }
  0xfb   :  { %v749_v47 = vrot.slane %v748_v42, 2  ;;  %831 = vmatpush.msra.mxu3 %v1988_v5 }
  0xfd   :  { %v750_v51 = vadd.f32 %v749_v47, %v748_v42  ;;  %832 = vmatpush.msra.mxu3 %v1991_v8  ;;  %v1995_v47 = vld [vmem:[#allocation4 + $0x1c8] sm:$0xff] }
  0xff   :  { %v751_v58 = vrot.slane %v750_v51, 1  ;;  %833 = vmatpush.msra.mxu3 %v1995_v47 }
 0x101   :  { %v752_v61 = vadd.f32 %v751_v58, %v750_v51 }
 0x103   :  { %803 = vmatmul.f32.vlgmr.msra.gmra.mxu1 %v752_v61  ;;  %v1998_v61 = vld [vmem:[#allocation4 + $0x1c0] sm:$0xff] }
 0x104   :  { %834 = vmatpush.msra.mxu3 %v1998_v61 }
 0x106   :  { %835 = vmatpush.msra.mxu3 %v2003_v56 }
 0x111   :  { %v595_v9 = vpop.f32.mrf.mxu0  ;;  %v615_v10 = vpop.f32.mrf.mxu1 }
 0x112   :  { %v635_v11 = vpop.f32.mrf.mxu2  ;;  %v616_v42 = vadd.f32 %v615_v10, %v595_v9  ;;  %v2008_v9 = vld [vmem:[#allocation4 + $0x1b0] sm:$0xff] }
 0x113   :  { %836 = vmatpush.msra.mxu3 %v2008_v9 }
 0x114   :  { %v636_v51 = vadd.f32 %v635_v11, %v616_v42  ;;  %v2011_v11 = vld [vmem:[#allocation4 + $0x1a8] sm:$0xff] }
 0x115   :  { %v655_v58 = vpop.f32.mrf.mxu3  ;;  %837 = vmatpush.msra.mxu3 %v2011_v11 }
 0x116   :  { %v2001_v6 = vadd.f32 %v655_v58, %v636_v51  ;;  %v2017_v58 = vld [vmem:[#allocation4 + $0x198] sm:$0xff] }
 0x117   :  { %838 = vmatpush.msra.mxu3 %v2014_v43  ;;  %2336 = vst [vmem:[#allocation24_spill] sm:$0xff] %v2017_v58 }
 0x118   :  { %2335 = vst [vmem:[#allocation23_spill] sm:$0xff] %v2001_v6  ;;  %v753_v63 = vsel %vm738_vm0, %v2001_v6, 0.0  ;;  %v2020_v6 = vld [vmem:[#allocation4 + $0x190] sm:$0xff] }
 0x119   :  { %v754_v10 = vrot.slane %v753_v63, 4  ;;  %839 = vmatpush.msra.mxu3 %v2017_v58  ;;  %2337 = vst [vmem:[#allocation25_spill] sm:$0xff] %v2020_v6 }
 0x11b   :  { %v755_v42 = vadd.f32 %v754_v10, %v753_v63  ;;  %840 = vmatpush.msra.mxu3 %v2020_v6  ;;  %v2025_v63 = vld [vmem:[#allocation4 + $0x180] sm:$0xff] }
 0x11c   :  { %2339 = vst [vmem:[#allocation27_spill] sm:$0xff] %v2025_v63 }
 0x11d   :  { %v756_v51 = vrot.slane %v755_v42, 2  ;;  %841 = vmatpush.msra.mxu3 %v2022_v62 }
 0x11f   :  { %v757_v36 = vadd.f32 %v756_v51, %v755_v42  ;;  %842 = vmatpush.msra.mxu3 %v2025_v63  ;;  %v2035_v63 = vld [vmem:[#allocation6 + $0x60] sm:$0xff] }
 0x120   :  { %864 = vmatpush.msrb.mxu0 %v2035_v63 }
 0x121   :  { %v758_v39 = vrot.slane %v757_v36, 1 }
 0x123   :  { %v759_v10 = vadd.f32 %v758_v39, %v757_v36 }
 0x125   :  { %823 = vmatmul.f32.vlgmr.msra.gmra.mxu2 %v759_v10  ;;  %v2033_v10 = vld [vmem:[#allocation6 + $0x70] sm:$0xff] }
 0x126   :  { %904 = vmatpush.msrb.mxu2 %v2033_v10 }
 0x131   :  { %v675_v34 = vpop.f32.mrf.mxu0 }
 0x132   :  { %v695_v60 = vpop.f32.mrf.mxu1 }
 0x133   :  { %v696_v42 = vadd.f32 %v695_v60, %v675_v34  ;;  %v2037_v34 = vld [vmem:[#allocation6 + $0x68] sm:$0xff]  ;;  %v2059_v60 = vld [vmem:[#allocation6 + $0x20] sm:$0xff] }
 0x134   :  { %v715_v51 = vpop.f32.mrf.mxu2  ;;  %884 = vmatpush.msrb.mxu1 %v2037_v34 }
 0x135   :  { %v716_v38 = vadd.f32 %v715_v51, %v696_v42  ;;  %v2065_v42 = vld [vmem:[#allocation6 + $0x38] sm:$0xff]  ;;  %v2069_v51 = vld [vmem:[#allocation6 + $0x10] sm:$0xff] }
 0x136   :  { %v735_v32 = vpop.f32.mrf.mxu3 }
 0x137   :  { %v2029_v58 = vadd.f32 %v735_v32, %v716_v38  ;;  %v2041_v32 = vld [vmem:[#allocation6 + $0x78] sm:$0xff]  ;;  %v2043_v38 = vld [vmem:[#allocation6 + $0x50] sm:$0xff] }
 0x138   :  { %924 = vmatpush.msrb.mxu3 %v2041_v32  ;;  %905 = vmatpush.msrb.mxu2 %v2043_v38 }
 0x139   :  { %2340 = vst [vmem:[#allocation28_spill] sm:$0xff] %v2029_v58  ;;  %v760_v59 = vsel %vm738_vm0, %v2029_v58, 0.0  ;;  %v2077_v58 = vld [vmem:[#allocation6 + $0x18] sm:$0xff] }
 0x13a   :  { %v761_v6 = vrot.slane %v760_v59, 4 }
 0x13c   :  { %v762_v37 = vadd.f32 %v761_v6, %v760_v59  ;;  %v2052_v6 = vld [vmem:[#allocation6 + $0x58] sm:$0xff]  ;;  %v2057_v59 = vld [vmem:[#allocation6 + $0x30] sm:$0xff] }
 0x13d   :  { %925 = vmatpush.msrb.mxu3 %v2052_v6  ;;  %906 = vmatpush.msrb.mxu2 %v2057_v59 }
 0x13e   :  { %v763_v30 = vrot.slane %v762_v37, 2 }
 0x13f   :  { %926 = vmatpush.msrb.mxu3 %v2065_v42  ;;  %907 = vmatpush.msrb.mxu2 %v2069_v51 }
 0x140   :  { %v764_v36 = vadd.f32 %v763_v30, %v762_v37  ;;  %v2048_v30 = vld [vmem:[#allocation6 + $0x40] sm:$0xff]  ;;  %v2050_v37 = vld [vmem:[#allocation6 + $0x48] sm:$0xff] }
 0x141   :  { %865 = vmatpush.msrb.mxu0 %v2048_v30  ;;  %885 = vmatpush.msrb.mxu1 %v2050_v37 }
 0x142   :  { %v765_v39 = vrot.slane %v764_v36, 1  ;;  %927 = vmatpush.msrb.mxu3 %v2077_v58  ;;  %1012 = vmatpush.msra.mxu2 %v1917_v40 }
 0x143   :  { %866 = vmatpush.msrb.mxu0 %v2059_v60 }
 0x144   :  { %v766_v62 = vadd.f32 %v765_v39, %v764_v36  ;;  %v2071_v36 = vld [vmem:[#allocation6] sm:$0xff]  ;;  %v2073_v39 = vld [vmem:[#allocation6 + $0x8] sm:$0xff]  ;;  %1013 = vmatpush.msra.mxu2 %v1919_v41 }
 0x145   :  { %867 = vmatpush.msrb.mxu0 %v2071_v36 }
 0x146   :  { %843 = vmatmul.f32.vlgmr.msra.gmra.mxu3 %v766_v62  ;;  %v2061_v62 = vld [vmem:[#allocation6 + $0x28] sm:$0xff]  ;;  %1014 = vmatpush.msra.mxu2 %v1925_v46 }
 0x147   :  { %886 = vmatpush.msrb.mxu1 %v2061_v62  ;;  %972 = vmatpush.msra.mxu0 %v1822_v13 }
 0x148   :  { %1032 = vmatpush.msra.mxu3 %v1976_v0  ;;  %1015 = vmatpush.msra.mxu2 %v1929_v50  ;;  %v2357_v50 = vld [vmem:[#allocation17_spill] sm:$0xff] }
 0x149   :  { %887 = vmatpush.msrb.mxu1 %v2073_v39  ;;  %973 = vmatpush.msra.mxu0 %v1828_v15 }
 0x14a   :  { %1033 = vmatpush.msra.mxu3 %v1978_v1  ;;  %1016 = vmatpush.msra.mxu2 %v1932_v53 }
 0x14b   :  { %992 = vmatpush.msra.mxu1 %v1825_v14  ;;  %974 = vmatpush.msra.mxu0 %v1834_v16  ;;  %v2341_v16 = vld [vmem:[#allocation9_spill] sm:$0xff] }
 0x14c   :  { %1034 = vmatpush.msra.mxu3 %v1982_v2  ;;  %1017 = vmatpush.msra.mxu2 %v1937_v57 }
 0x14d   :  { %993 = vmatpush.msra.mxu1 %v1832_v45  ;;  %975 = vmatpush.msra.mxu0 %v1838_v49  ;;  %v2342_v49 = vld [vmem:[#allocation13_spill] sm:$0xff] }
 0x14e   :  { %1035 = vmatpush.msra.mxu3 %v1985_v3  ;;  %1018 = vmatpush.msra.mxu2 %v1943_v4 }
 0x14f   :  { %994 = vmatpush.msra.mxu1 %v1848_v17  ;;  %976 = vmatpush.msra.mxu0 %v1842_v54  ;;  %v2344_v17 = vld [vmem:[#allocation24_spill] sm:$0xff] }
 0x150   :  { %1036 = vmatpush.msra.mxu3 %v1988_v5  ;;  %1019 = vmatpush.msra.mxu2 %v1948_v7 }
 0x151   :  { %995 = vmatpush.msra.mxu1 %v1854_v19  ;;  %977 = vmatpush.msra.mxu0 %v1846_v55  ;;  %v2343_v55 = vld [vmem:[#allocation19_spill] sm:$0xff]  ;;  %v2345_v19 = vld [vmem:[#allocation10_spill] sm:$0xff] }
 0x152   :  { %1037 = vmatpush.msra.mxu3 %v1991_v8  ;;  %1020 = vmatpush.msra.mxu2 %v1953_v12 }
 0x153   :  { %996 = vmatpush.msra.mxu1 %v1860_v21  ;;  %978 = vmatpush.msra.mxu0 %v1852_v18 }
 0x154   :  { %1038 = vmatpush.msra.mxu3 %v1995_v47  ;;  %1021 = vmatpush.msra.mxu2 %v1956_v44  ;;  %v2359_v47 = vld [vmem:[#allocation23_spill] sm:$0xff] }
 0x155   :  { %997 = vmatpush.msra.mxu1 %v1866_v23  ;;  %979 = vmatpush.msra.mxu0 %v1858_v20  ;;  %v2346_v20 = vld [vmem:[#allocation14_spill] sm:$0xff]  ;;  %v2348_v23 = vld [vmem:[#allocation25_spill] sm:$0xff] }
 0x156   :  { %1039 = vmatpush.msra.mxu3 %v1998_v61  ;;  %1022 = vmatpush.msra.mxu2 %v1959_v48 }
 0x157   :  { %998 = vmatpush.msra.mxu1 %v1872_v25  ;;  %980 = vmatpush.msra.mxu0 %v1864_v22  ;;  %v2347_v22 = vld [vmem:[#allocation20_spill] sm:$0xff]  ;;  %v2350_v25 = vld [vmem:[#allocation15_spill] sm:$0xff] }
 0x158   :  { %1040 = vmatpush.msra.mxu3 %v2003_v56  ;;  %1023 = vmatpush.msra.mxu2 %v1962_v52  ;;  %v2358_v56 = vld [vmem:[#allocation18_spill] sm:$0xff] }
 0x159   :  { %999 = vmatpush.msra.mxu1 %v1876_v27  ;;  %981 = vmatpush.msra.mxu0 %v1870_v24  ;;  %v2349_v24 = vld [vmem:[#allocation11_spill] sm:$0xff]  ;;  %v2351_v27 = vld [vmem:[#allocation21_spill] sm:$0xff] }
 0x15a   :  { %1041 = vmatpush.msra.mxu3 %v2008_v9  ;;  %1024 = vmatpush.msra.mxu2 %v2343_v55  ;;  %v2360_v9 = vld [vmem:[#allocation28_spill] sm:$0xff] }
 0x15b   :  { %1000 = vmatpush.msra.mxu1 %v1884_v29  ;;  %982 = vmatpush.msra.mxu0 %v1874_v26  ;;  %v2353_v29 = vld [vmem:[#allocation12_spill] sm:$0xff] }
 0x15c   :  { %1042 = vmatpush.msra.mxu3 %v2011_v11  ;;  %1025 = vmatpush.msra.mxu2 %v2347_v22 }
 0x15d   :  { %1001 = vmatpush.msra.mxu1 %v1890_v31  ;;  %983 = vmatpush.msra.mxu0 %v1882_v28  ;;  %v2352_v28 = vld [vmem:[#allocation26_spill] sm:$0xff]  ;;  %v2354_v31 = vld [vmem:[#allocation16_spill] sm:$0xff] }
 0x15e   :  { %1043 = vmatpush.msra.mxu3 %v2014_v43  ;;  %1026 = vmatpush.msra.mxu2 %v2351_v27  ;;  %v1643_v27 = vld [vmem:[%s2295_s5 + $0x78] sm:$0xff] }
 0x15f   :  { %1002 = vmatpush.msra.mxu1 %v1896_v33  ;;  %984 = vmatpush.msra.mxu0 %v2341_v16  ;;  %v2355_v33 = vld [vmem:[#allocation22_spill] sm:$0xff] }
 0x160   :  { %1044 = vmatpush.msra.mxu3 %v2344_v17  ;;  %1027 = vmatpush.msra.mxu2 %v2355_v33  ;;  %v1634_v33 = vld [vmem:[%s2295_s5 + $0x30] sm:$0xff] }
 0x161   :  { %1003 = vmatpush.msra.mxu1 %v1902_v35  ;;  %985 = vmatpush.msra.mxu0 %v2345_v19  ;;  %v2356_v35 = vld [vmem:[#allocation27_spill] sm:$0xff] }
 0x162   :  { %1045 = vmatpush.msra.mxu3 %v2348_v23 }
 0x163   :  { %1004 = vmatpush.msra.mxu1 %v2342_v49  ;;  %986 = vmatpush.msra.mxu0 %v2349_v24 }
 0x164   :  { %1046 = vmatpush.msra.mxu3 %v2352_v28  ;;  %v1651_v28 = vld [vmem:[%s2295_s5 + $0xb8] sm:$0xff] }
 0x165   :  { %1005 = vmatpush.msra.mxu1 %v2346_v20  ;;  %987 = vmatpush.msra.mxu0 %v2353_v29  ;;  %v1659_v29 = vld [vmem:[%s2295_s5 + $0xf8] sm:$0xff] }
 0x166   :  { %1047 = vmatpush.msra.mxu3 %v2356_v35  ;;  %v1642_v35 = vld [vmem:[%s2295_s5 + $0x70] sm:$0xff] }
 0x167   :  { %1006 = vmatpush.msra.mxu1 %v2350_v25  ;;  %v1635_v25 = vld [vmem:[%s2295_s5 + $0x38] sm:$0xff] }
 0x169   :  { %1007 = vmatpush.msra.mxu1 %v2354_v31 }
 0x176   :  { %v784_v14 = vpop.f32.mrf.mxu0 }
 0x180   :  { %v804_v13 = vpop.f32.mrf.mxu1 }
 0x181   :  { %v805_v45 = vadd.f32 %v804_v13, %v784_v14 }
 0x1a8   :  { %v824_v15 = vpop.f32.mrf.mxu2 }
 0x1a9   :  { %v825_v54 = vadd.f32 %v824_v15, %v805_v45 }
 0x1c9   :  { %v844_v18 = vpop.f32.mrf.mxu3 }
 0x1ca   :  { %v845_v21 = vadd.f32 %v844_v18, %v825_v54 }
 0x1cc   :  { %v2139_v26 = vmul.f32 0.03125, %v845_v21 }
 0x1ce   :  { %1492 = vmatmul.msk.f32.vlgmr.msrb.gmra.mxu0 %vm848_vm1, %v2139_v26  ;;  %1493 = vmatmul.msk.f32.vlgmr.msrb.gmra.mxu1 %vm848_vm1, %v2139_v26 }
 0x1cf   :  { %1494 = vmatmul.msk.f32.vlgmr.msrb.gmra.mxu2 %vm848_vm1, %v2139_v26  ;;  %1495 = vmatmul.msk.f32.vlgmr.msrb.gmra.mxu3 %vm848_vm1, %v2139_v26 }
 0x1d0   :  { %1127 = vmatpush.msrb.mxu2 %v2033_v10  ;;  %1087 = vmatpush.msrb.mxu0 %v2035_v63 }
 0x1d1   :  { %1107 = vmatpush.msrb.mxu1 %v2037_v34  ;;  %1147 = vmatpush.msrb.mxu3 %v2041_v32 }
 0x1d2   :  { %1128 = vmatpush.msrb.mxu2 %v2043_v38  ;;  %1088 = vmatpush.msrb.mxu0 %v2048_v30 }
 0x1d3   :  { %1108 = vmatpush.msrb.mxu1 %v2050_v37  ;;  %1148 = vmatpush.msrb.mxu3 %v2052_v6 }
 0x1d4   :  { %1129 = vmatpush.msrb.mxu2 %v2057_v59  ;;  %1089 = vmatpush.msrb.mxu0 %v2059_v60 }
 0x1d5   :  { %1109 = vmatpush.msrb.mxu1 %v2061_v62  ;;  %1149 = vmatpush.msrb.mxu3 %v2065_v42 }
 0x1d6   :  { %1130 = vmatpush.msrb.mxu2 %v2069_v51  ;;  %1090 = vmatpush.msrb.mxu0 %v2071_v36 }
 0x1d7   :  { %1110 = vmatpush.msrb.mxu1 %v2073_v39  ;;  %1150 = vmatpush.msrb.mxu3 %v2077_v58 }
 0x24b   :  { %v869_v40 = vpop.f32.mrf.mxu0  ;;  %v889_v41 = vpop.f32.mrf.mxu1 }
 0x24c   :  { %v932_v43 = vperm.slane %v869_v40, 0  ;;  %v933_v46 = vperm.slane %v889_v41, 0  ;;  %v1650_v40 = vld [vmem:[%s2295_s5 + $0xb0] sm:$0xff] }
 0x24d   :  { %v1658_v41 = vld [vmem:[%s2295_s5 + $0xf0] sm:$0xff] }
 0x24e   :  { %v936_v53 = vsub.f32 %v2357_v50, %v932_v43  ;;  %v937_v57 = vsub.f32 %v2358_v56, %v933_v46  ;;  %v1633_v43 = vld [vmem:[%s2295_s5 + $0x28] sm:$0xff] }
 0x24f   :  { %v1641_v46 = vld [vmem:[%s2295_s5 + $0x68] sm:$0xff] }
 0x250   :  { %v940_v4 = vmul.f32 %v936_v53, %v936_v53  ;;  %v941_v7 = vmul.f32 %v937_v57, %v937_v57  ;;  %v1649_v53 = vld [vmem:[%s2295_s5 + $0xa8] sm:$0xff] }
 0x251   :  { %v1657_v57 = vld [vmem:[%s2295_s5 + $0xe8] sm:$0xff] }
 0x252   :  { %v944_v12 = vsel %vm738_vm0, %v940_v4, 0.0  ;;  %v951_v44 = vsel %vm738_vm0, %v941_v7, 0.0  ;;  %v909_v48 = vpop.f32.mrf.mxu2  ;;  %v929_v52 = vpop.f32.mrf.mxu3  ;;  %v1632_v7 = vld [vmem:[%s2295_s5 + $0x20] sm:$0xff] }
 0x253   :  { %v945_v0 = vrot.slane %v944_v12, 4  ;;  %v952_v1 = vrot.slane %v951_v44, 4  ;;  %v934_v2 = vperm.slane %v909_v48, 0  ;;  %v935_v3 = vperm.slane %v929_v52, 0  ;;  %v1648_v48 = vld [vmem:[%s2295_s5 + $0xa0] sm:$0xff] }
 0x254   :  { %v1656_v52 = vld [vmem:[%s2295_s5 + $0xe0] sm:$0xff] }
 0x255   :  { %v946_v5 = vadd.f32 %v945_v0, %v944_v12  ;;  %v953_v8 = vadd.f32 %v952_v1, %v951_v44  ;;  %v938_v61 = vsub.f32 %v2359_v47, %v934_v2  ;;  %v939_v11 = vsub.f32 %v2360_v9, %v935_v3  ;;  %v1640_v12 = vld [vmem:[%s2295_s5 + $0x60] sm:$0xff]  ;;  %v1631_v1 = vld [vmem:[%s2295_s5 + $0x18] sm:$0xff] }
 0x256   :  { %v1639_v2 = vld [vmem:[%s2295_s5 + $0x58] sm:$0xff] }
 0x257   :  { %v947_v58 = vrot.slane %v946_v5, 2  ;;  %v954_v63 = vrot.slane %v953_v8, 2  ;;  %v942_v10 = vmul.f32 %v938_v61, %v938_v61  ;;  %v943_v34 = vmul.f32 %v939_v11, %v939_v11  ;;  %v1638_v61 = vld [vmem:[%s2295_s5 + $0x50] sm:$0xff] }
 0x259   :  { %v948_v32 = vadd.f32 %v947_v58, %v946_v5  ;;  %v955_v38 = vadd.f32 %v954_v63, %v953_v8  ;;  %v958_v30 = vsel %vm738_vm0, %v942_v10, 0.0  ;;  %v965_v37 = vsel %vm738_vm0, %v943_v34, 0.0  ;;  %v1630_v8 = vld [vmem:[%s2295_s5 + $0x10] sm:$0xff]  ;;  %v407_v58 = vld [vmem:[%s2294_s4] sm:$0x3] }
 0x25a   :  { %v959_v6 = vrot.slane %v958_v30, 4  ;;  %v966_v59 = vrot.slane %v965_v37, 4 }
 0x25b   :  { %v949_v60 = vrot.slane %v948_v32, 1  ;;  %v956_v62 = vrot.slane %v955_v38, 1 }
 0x25c   :  { %v960_v42 = vadd.f32 %v959_v6, %v958_v30  ;;  %v967_v51 = vadd.f32 %v966_v59, %v965_v37  ;;  %v1647_v37 = vld [vmem:[%s2295_s5 + $0x98] sm:$0xff]  ;;  %v1629_v6 = vld [vmem:[%s2295_s5 + $0x8] sm:$0xff] }
 0x25d   :  { %v950_v36 = vadd.f32 %v949_v60, %v948_v32  ;;  %v957_v39 = vadd.f32 %v956_v62, %v955_v38  ;;  %v1637_v59 = vld [vmem:[%s2295_s5 + $0x48] sm:$0xff]  ;;  %v1646_v60 = vld [vmem:[%s2295_s5 + $0x90] sm:$0xff] }
 0x25e   :  { %v961_v13 = vrot.slane %v960_v42, 2  ;;  %v968_v14 = vrot.slane %v967_v51, 2  ;;  %v1654_v62 = vld [vmem:[%s2295_s5 + $0xd0] sm:$0xff] }
 0x25f   :  { %988 = vmatmul.f32.vlgmr.msra.gmra.mxu0 %v950_v36  ;;  %1008 = vmatmul.f32.vlgmr.msra.gmra.mxu1 %v957_v39  ;;  %v1645_v36 = vld [vmem:[%s2295_s5 + $0x88] sm:$0xff] }
 0x260   :  { %v962_v15 = vadd.f32 %v961_v13, %v960_v42  ;;  %v969_v45 = vadd.f32 %v968_v14, %v967_v51  ;;  %1431 = vmatpush.bf16.msra.mxu0 %v1635_v25  ;;  %1444 = vmatpush.bf16.msra.mxu1 %v1643_v27  ;;  %v1628_v42 = vld [vmem:[%s2295_s5] sm:$0xff]  ;;  %v1653_v39 = vld [vmem:[%s2295_s5 + $0xc8] sm:$0xff] }
 0x261   :  { %v1636_v51 = vld [vmem:[%s2295_s5 + $0x40] sm:$0xff] }
 0x262   :  { %v963_v16 = vrot.slane %v962_v15, 1  ;;  %v970_v49 = vrot.slane %v969_v45, 1  ;;  %v1644_v13 = vld [vmem:[%s2295_s5 + $0x80] sm:$0xff] }
 0x263   :  { %v1652_v14 = vld [vmem:[%s2295_s5 + $0xc0] sm:$0xff] }
 0x264   :  { %v964_v54 = vadd.f32 %v963_v16, %v962_v15  ;;  %v971_v55 = vadd.f32 %v970_v49, %v969_v45  ;;  %1432 = vmatpush.bf16.msra.mxu0 %v1634_v33  ;;  %1445 = vmatpush.bf16.msra.mxu1 %v1642_v35 }
 0x266   :  { %1028 = vmatmul.f32.vlgmr.msra.gmra.mxu2 %v964_v54  ;;  %1048 = vmatmul.f32.vlgmr.msra.gmra.mxu3 %v971_v55 }
 0x267   :  { %1457 = vmatpush.bf16.msra.mxu2 %v1651_v28  ;;  %1470 = vmatpush.bf16.msra.mxu3 %v1659_v29 }
 0x268   :  { %1433 = vmatpush.bf16.msra.mxu0 %v1633_v43  ;;  %1446 = vmatpush.bf16.msra.mxu1 %v1641_v46 }
 0x26b   :  { %1458 = vmatpush.bf16.msra.mxu2 %v1650_v40  ;;  %1471 = vmatpush.bf16.msra.mxu3 %v1658_v41 }
 0x26c   :  { %1434 = vmatpush.bf16.msra.mxu0 %v1632_v7  ;;  %1447 = vmatpush.bf16.msra.mxu1 %v1640_v12 }
 0x26f   :  { %1459 = vmatpush.bf16.msra.mxu2 %v1649_v53  ;;  %1472 = vmatpush.bf16.msra.mxu3 %v1657_v57 }
 0x270   :  { %1435 = vmatpush.bf16.msra.mxu0 %v1631_v1  ;;  %1448 = vmatpush.bf16.msra.mxu1 %v1639_v2 }
 0x273   :  { %1460 = vmatpush.bf16.msra.mxu2 %v1648_v48  ;;  %1473 = vmatpush.bf16.msra.mxu3 %v1656_v52 }
 0x274   :  { %1436 = vmatpush.bf16.msra.mxu0 %v1630_v8  ;;  %1449 = vmatpush.bf16.msra.mxu1 %v1638_v61 }
 0x277   :  { %1461 = vmatpush.bf16.msra.mxu2 %v1647_v37 }
 0x278   :  { %1437 = vmatpush.bf16.msra.mxu0 %v1629_v6  ;;  %1450 = vmatpush.bf16.msra.mxu1 %v1637_v59 }
 0x27b   :  { %1462 = vmatpush.bf16.msra.mxu2 %v1646_v60 }
 0x27c   :  { %1438 = vmatpush.bf16.msra.mxu0 %v1628_v42  ;;  %1451 = vmatpush.bf16.msra.mxu1 %v1636_v51 }
 0x27f   :  { %1463 = vmatpush.bf16.msra.mxu2 %v1645_v36 }
 0x283   :  { %1464 = vmatpush.bf16.msra.mxu2 %v1644_v13 }
 0x2dc   :  { %v989_v17 = vpop.f32.mrf.mxu0  ;;  %v1009_v18 = vpop.f32.mrf.mxu1 }
 0x2dd   :  { %v1010_v19 = vadd.f32 %v1009_v18, %v989_v17 }
 0x2e9   :  { %v1029_v20 = vpop.f32.mrf.mxu2  ;;  %v1049_v22 = vpop.f32.mrf.mxu3 }
 0x2ea   :  { %v1030_v21 = vadd.f32 %v1029_v20, %v1010_v19 }
 0x2ec   :  { %v1050_v23 = vadd.f32 %v1049_v22, %v1030_v21 }
 0x2ee   :  { %v1052_v24 = vmul.f32 0.03125, %v1050_v23 }
 0x2f0   :  { %v1053_v31 = vadd.f32 1e-05, %v1052_v24 }
 0x2f2   :  { %1667 = vrsqrt.f32 %v1053_v31  ;;  %vm1060_vm3 = vweird.f32 %v1053_v31 }
 0x2f8   :  { %v1668_v4 = vpop.eup %1667 }
 0x2f9   :  { %v1055_v44 = vmul.f32 %v1668_v4, %v1053_v31  ;;  %vm1061_vm2 = vweird.f32 %v1668_v4 }
 0x2fa   :  { %vm1062_vm4 = vmor %vm1060_vm3, %vm1061_vm2 }
 0x2fb   :  { %v1056_v0 = vmul.f32 %v1668_v4, %v1055_v44 }
 0x2fd   :  { %v1057_v3 = vmul.f32 0.5, %v1056_v0 }
 0x2ff   :  { %v1058_v5 = vsub.f32 1.5, %v1057_v3 }
 0x301   :  { %v1059_v11 = vmul.f32 %v1668_v4, %v1058_v5 }
 0x303   :  { %v1063_v63 = vsel %vm1062_vm4, %v1668_v4, %v1059_v11 }
 0x304   :  { %v1064_v10 = vmul.f32 %v1063_v63, %v407_v58 }
 0x306   :  { %v1065_v34 = vmul.f32 %v1064_v10, %v2139_v26  ;;  %v1655_v26 = vld [vmem:[%s2295_s5 + $0xd8] sm:$0xff] }
 0x307   :  { %1474 = vmatpush.bf16.msra.mxu3 %v1655_v26 }
 0x308   :  { %v1067_v32 = vrot.slane %v1065_v34, 7 }
 0x30a   :  { %v1069_v38 = vsub.f32 %v407_v58, %v1067_v32 }
 0x30b   :  { %1475 = vmatpush.bf16.msra.mxu3 %v1654_v62 }
 0x30c   :  { %v1071_v30 = vsel %vm1070_vm5, %v1064_v10, %v1069_v38 }
 0x30d   :  { %1496 = vmatmul.msk.f32.vlgmr.msrb.gmra.mxu0 %vm848_vm1, %v1071_v30  ;;  %1497 = vmatmul.msk.f32.vlgmr.msrb.gmra.mxu1 %vm848_vm1, %v1071_v30 }
 0x30e   :  { %1498 = vmatmul.msk.f32.vlgmr.msrb.gmra.mxu2 %vm848_vm1, %v1071_v30  ;;  %1499 = vmatmul.msk.f32.vlgmr.msrb.gmra.mxu3 %vm848_vm1, %v1071_v30 }
 0x30f   :  { %1476 = vmatpush.bf16.msra.mxu3 %v1653_v39 }
 0x313   :  { %1477 = vmatpush.bf16.msra.mxu3 %v1652_v14 }
 0x38a   :  { %v1092_v15 = vpop.f32.mrf.mxu0  ;;  %v1112_v45 = vpop.f32.mrf.mxu1 }
 0x38b   :  { %v1155_v16 = vperm.slane %v1092_v15, 0  ;;  %v1156_v49 = vperm.slane %v1112_v45, 0  ;;  %v1163_v55 = vperm.slane %v1092_v15, 1  ;;  %v1164_v18 = vperm.slane %v1112_v45, 1 }
 0x38d   :  { %v1159_v54 = vmul.f32 %v1155_v16, %v2357_v50  ;;  %v1160_v17 = vmul.f32 %v1156_v49, %v2358_v56 }
 0x38f   :  { %v1167_v19 = vadd.f32 %v1163_v55, %v1159_v54  ;;  %v1168_v20 = vadd.f32 %v1164_v18, %v1160_v17 }
 0x391   :  { %v1171_v21 = vpack.c.bf16 %v1167_v19, %v1167_v19  ;;  %v1172_v22 = vpack.c.bf16 %v1168_v20, %v1168_v20  ;;  %v1132_v23 = vpop.f32.mrf.mxu2  ;;  %v1152_v24 = vpop.f32.mrf.mxu3 }
 0x392   :  { %v1157_v25 = vperm.slane %v1132_v23, 0  ;;  %v1158_v27 = vperm.slane %v1152_v24, 0  ;;  %v1165_v29 = vperm.slane %v1132_v23, 1  ;;  %v1166_v50 = vperm.slane %v1152_v24, 1 }
 0x393   :  { %1439 = vmatmul.bf16.vlgmr.msra.gmra.mxu0 %v1171_v21  ;;  %1452 = vmatmul.bf16.vlgmr.msra.gmra.mxu1 %v1172_v22 }
 0x394   :  { %v1161_v28 = vmul.f32 %v1157_v25, %v2359_v47  ;;  %v1162_v31 = vmul.f32 %v1158_v27, %v2360_v9 }
 0x396   :  { %v1169_v33 = vadd.f32 %v1165_v29, %v1161_v28  ;;  %v1170_v35 = vadd.f32 %v1166_v50, %v1162_v31 }
 0x398   :  { %v1173_v56 = vpack.c.bf16 %v1169_v33, %v1169_v33  ;;  %v1174_v40 = vpack.c.bf16 %v1170_v35, %v1170_v35 }
 0x39a   :  { %1465 = vmatmul.bf16.vlgmr.msra.gmra.mxu2 %v1173_v56  ;;  %1478 = vmatmul.bf16.vlgmr.msra.gmra.mxu3 %v1174_v40 }
 0x410   :  { %v1440_v41 = vpop.f32.mrf.mxu0  ;;  %v1453_v43 = vpop.f32.mrf.mxu1 }
 0x411   :  { %v1454_v57 = vadd.f32 %v1453_v43, %v1440_v41 }
 0x418   :  { %v1442_v46 = vpop.f32.mrf.mxu0  ;;  %v1455_v53 = vpop.f32.mrf.mxu1 }
 0x41d   :  { %v1466_v4 = vpop.f32.mrf.mxu2  ;;  %v1479_v7 = vpop.f32.mrf.mxu3 }
 0x41e   :  { %v1467_v12 = vadd.f32 %v1466_v4, %v1454_v57 }
 0x420   :  { %v1480_v44 = vadd.f32 %v1479_v7, %v1467_v12 }
 0x422   :  { %1669 = vtanh.f32 %v1480_v44 }
 0x425   :  { %v1468_v47 = vpop.f32.mrf.mxu2  ;;  %v1481_v48 = vpop.f32.mrf.mxu3 }
 0x428   :  { %v1670_v9 = vpop.eup %1669 }
 0x429   :  { %v1484_v52 = vpack.c.bf16 %v1670_v9, %v1670_v9 }
 0x42b   :  { %1485 = vst [vmem:[%s2296_s6] sm:$0x1] %v1484_v52 }
 0x42c   :  { %1490 = vsyncpa [#allocation3], 1 }
 0x42d   :  { %1491 = vsyncpa [#allocation5], 1 }

</bundles_post_ra>
